<compile_context>
chip_gen: v7x
topology: tpu7x:2x2x1
jax: 0.10.0
libtpu: 0.0.40
codegen_flags: <defaults>
</compile_context>

<pallas_src>
import functools

import jax
import jax.numpy as jnp
from jax.experimental import pallas as pl
from jax.experimental.pallas import tpu as pltpu


def _build_patches(x_ref, lhs_ref, in_row0, *, k, s, tile_oh, ow, cin):
    """Implicit im2col into VMEM scratch.

    lhs_ref[(r*ow + ow'), (kh*k + kw)*cin + c] = x_pad[in_row0 + r*s + kh,
                                                       ow'*s + kw, c]
    x_ref: (1, Hp, Wp, Cin) padded NHWC input slab.
    lhs_ref: (tile_oh*ow, k*k*cin) VMEM scratch (compute dtype).
    """
    tile_m = tile_oh * ow
    for kh in range(k):
        if s == 1:
            slab = x_ref[0, pl.ds(in_row0 + kh, tile_oh), :, :]
        else:
            # TODO(synk): s>1 uses value-level strided slices (not exercised
            # by the harness); a wrapper-side space-to-batch (s*s phase)
            # decomposition would keep the kernel stride-1.
            slab = x_ref[0, pl.ds(in_row0 + kh, (tile_oh - 1) * s + 1), :, :]
            slab = slab[::s]
        for kw in range(k):
            if s == 1:
                piece = slab[:, kw:kw + ow, :]
            else:
                piece = slab[:, kw:kw + (ow - 1) * s + 1:s, :]
            q = (kh * k + kw) * cin
            lhs_ref[:, q:q + cin] = (
                piece.reshape(tile_m, cin).astype(lhs_ref.dtype))


def _conv_bn_prelu_kernel(x_ref, w_ref, shift_ref, alpha_ref, o_ref, lhs_ref,
                          *, k, s, tile_oh, ow, cin):
    in_row0 = pl.multiple_of(pl.program_id(1) * (tile_oh * s), tile_oh * s)
    _build_patches(x_ref, lhs_ref, in_row0,
                   k=k, s=s, tile_oh=tile_oh, ow=ow, cin=cin)
    # Single MXU contraction, K = k*k*Cin, f32 accumulation + f32 epilogue.
    y = jnp.dot(lhs_ref[...], w_ref[...], preferred_element_type=jnp.float32)
    y = y + shift_ref[...]                                     # folded BN shift
    y = jnp.where(y > 0, y, alpha_ref[...] * y)                # PReLU
    o_ref[0] = y.reshape(tile_oh, ow, y.shape[-1]).astype(o_ref.dtype)


def _conv_bn_kernel(x_ref, w_ref, shift_ref, o_ref, lhs_ref,
                    *, k, s, tile_oh, ow, cin):
    in_row0 = pl.multiple_of(pl.program_id(1) * (tile_oh * s), tile_oh * s)
    _build_patches(x_ref, lhs_ref, in_row0,
                   k=k, s=s, tile_oh=tile_oh, ow=ow, cin=cin)
    y = jnp.dot(lhs_ref[...], w_ref[...], preferred_element_type=jnp.float32)
    y = y + shift_ref[...]
    o_ref[0] = y.reshape(tile_oh, ow, y.shape[-1]).astype(o_ref.dtype)


def _pick_tile_oh(oh, ow, max_tile_m):
    """Largest divisor of OH whose tile (tile_oh*OW rows) stays bounded."""
    best = 1
    for d in range(1, oh + 1):
        if oh % d == 0 and d * ow <= max_tile_m:
            best = d
    return best


def conv_block_forward(x, conv_w, bn_gamma, bn_beta, bn_mean, bn_var,
                       prelu_alpha=None, *, k, s, p, linear=False, eps=1e-5,
                       tile_n=128, max_tile_m=512,
                       compute_dtype=jnp.bfloat16, out_dtype=None,
                       out_layout="NCHW"):
    """Fused Conv2d(bias=False) + BatchNorm2d(eval) + (optional) PReLU.

    x: (N, Cin, H, W), conv_w: (Cout, Cin, k, k).  Returns NCHW (default,
    matching the PyTorch module) or NHWC, in `out_dtype` (default: x.dtype).
    """
    N, Cin, H, W = x.shape
    Cout = conv_w.shape[0]
    assert conv_w.shape == (Cout, Cin, k, k)
    assert tile_n % 128 == 0
    if out_dtype is None:
        out_dtype = x.dtype

    OH = (H + 2 * p - k) // s + 1
    OW = (W + 2 * p - k) // s + 1
    Hp, Wp = H + 2 * p, W + 2 * p
    tile_oh = _pick_tile_oh(OH, OW, max_tile_m)
    tile_m = tile_oh * OW

    # NCHW -> NHWC (channels minor) + one spatial zero-pad (wrapper-side).
    x_nhwc = jnp.transpose(x, (0, 2, 3, 1))
    x_pad = jnp.pad(x_nhwc, ((0, 0), (p, p), (p, p), (0, 0)))

    # Fold BN (inference form) into the weight + a per-channel f32 shift, and
    # fold all k*k taps into the contraction: W[(kh*k+kw)*Cin + c, cout].
    scale = bn_gamma / jnp.sqrt(bn_var + eps)                   # (Cout,)
    shift = bn_beta - bn_mean * scale                           # (Cout,)
    w = conv_w * scale[:, None, None, None]                     # (Cout,Cin,k,k)
    w = jnp.transpose(w, (2, 3, 1, 0)).reshape(k * k * Cin, Cout)

    # Lane-dense output tiles: pad Cout up to a multiple of tile_n (>= 128).
    Cout_pad = ((Cout + tile_n - 1) // tile_n) * tile_n
    pad_c = Cout_pad - Cout
    if pad_c:
        w = jnp.pad(w, ((0, 0), (0, pad_c)))
        shift = jnp.pad(shift, (0, pad_c))
    shift2d = shift.reshape(1, Cout_pad).astype(jnp.float32)

    grid = (N, OH // tile_oh, Cout_pad // tile_n)
    in_specs = [
        # Whole padded image per sample; resident across the (r, j) axes.
        pl.BlockSpec((1, Hp, Wp, Cin), lambda n, r, j: (n, 0, 0, 0)),
        # BN-folded weight tile; resident across the row axis r.
        pl.BlockSpec((k * k * Cin, tile_n), lambda n, r, j: (0, j)),
        pl.BlockSpec((1, tile_n), lambda n, r, j: (0, j)),
    ]
    args = [x_pad.astype(compute_dtype), w.astype(compute_dtype), shift2d]

    kern_kwargs = dict(k=k, s=s, tile_oh=tile_oh, ow=OW, cin=Cin)
    if linear:
        kernel = functools.partial(_conv_bn_kernel, **kern_kwargs)
    else:
        # PReLU alpha: per-channel (Cout,) or a single shared scalar.
        alpha = jnp.reshape(jnp.asarray(prelu_alpha, jnp.float32), (-1,))
        alpha = jnp.broadcast_to(alpha, (Cout,))
        if pad_c:
            alpha = jnp.pad(alpha, (0, pad_c))
        in_specs.append(pl.BlockSpec((1, tile_n), lambda n, r, j: (0, j)))
        args.append(alpha.reshape(1, Cout_pad).astype(jnp.float32))
        kernel = functools.partial(_conv_bn_prelu_kernel, **kern_kwargs)

    out = pl.pallas_call(
        kernel,
        out_shape=jax.ShapeDtypeStruct((N, OH, OW, Cout_pad), out_dtype),
        grid_spec=pltpu.PrefetchScalarGridSpec(
            num_scalar_prefetch=0,
            grid=grid,
            in_specs=in_specs,
            out_specs=pl.BlockSpec((1, tile_oh, OW, tile_n),
                                   lambda n, r, j: (n, r, 0, j)),
            scratch_shapes=[pltpu.VMEM((tile_m, k * k * Cin), compute_dtype)],
        ),
        compiler_params=pltpu.CompilerParams(
            dimension_semantics=("parallel", "parallel", "parallel"),
            # Raise toward 64-96 MiB on v5e/v6e for bigger tiles if needed.
            vmem_limit_bytes=32 * 1024 * 1024),
    )(*args)

    out = out[..., :Cout]                    # drop padded output channels
    if out_layout == "NHWC":
        return out                           # skip the NHWC->NCHW HBM pass
    return jnp.transpose(out, (0, 3, 1, 2))  # PyTorch-module NCHW semantics


def _reference(x, conv_w, bn_gamma, bn_beta, bn_mean, bn_var,
               prelu_alpha, *, k, s, p, linear=False, eps=1e-5):
    y = jax.lax.conv_general_dilated(
        x, conv_w, window_strides=(s, s), padding=[(p, p), (p, p)],
        dimension_numbers=("NCHW", "OIHW", "NCHW"))
    scale = (bn_gamma / jnp.sqrt(bn_var + eps)).reshape(1, -1, 1, 1)
    shift = (bn_beta - bn_mean * bn_gamma / jnp.sqrt(bn_var + eps)).reshape(1, -1, 1, 1)
    y = y * scale + shift
    if linear:
        return y
    a = prelu_alpha.reshape(1, -1, 1, 1)
    return jnp.where(y > 0, y, a * y)


if __name__ == "__main__":
    key = jax.random.PRNGKey(0)

    # ---- Case 1: ConvBlock(inp=4, oup=8, k=3, s=1, p=1), per-channel PReLU --
    N, Cin, H, W = 2, 4, 16, 16
    Cout, k, s, p = 8, 3, 1, 1
    kx, kw_, kg, kb, km, kv = jax.random.split(key, 6)
    x = jax.random.normal(kx, (N, Cin, H, W), jnp.float32)
    conv_w = jax.random.normal(kw_, (Cout, Cin, k, k), jnp.float32) * 0.1
    bn_gamma = 1.0 + 0.1 * jax.random.normal(kg, (Cout,), jnp.float32)
    bn_beta = 0.1 * jax.random.normal(kb, (Cout,), jnp.float32)
    bn_mean = 0.1 * jax.random.normal(km, (Cout,), jnp.float32)
    bn_var = jnp.abs(jax.random.normal(kv, (Cout,), jnp.float32)) + 0.5
    prelu_alpha = jnp.full((Cout,), 0.25, jnp.float32)

    ref = _reference(x, conv_w, bn_gamma, bn_beta, bn_mean, bn_var,
                     prelu_alpha, k=k, s=s, p=p, linear=False)

    # 1a) Exact path (f32 MXU inputs), multi-row-tile grid (two row steps).
    out_f32 = conv_block_forward(x, conv_w, bn_gamma, bn_beta, bn_mean, bn_var,
                                 prelu_alpha, k=k, s=s, p=p, linear=False,
                                 compute_dtype=jnp.float32, max_tile_m=128)
    out_f32 = jax.block_until_ready(out_f32)
    assert out_f32.shape == (N, Cout, H, W)
    assert jnp.allclose(out_f32, ref, atol=1e-4, rtol=1e-4)

    # 1b) Fast path: bf16 MXU inputs + bf16 NHWC output (reduced writeback).
    out_fast = conv_block_forward(x, conv_w, bn_gamma, bn_beta, bn_mean, bn_var,
                                  prelu_alpha, k=k, s=s, p=p, linear=False,
                                  max_tile_m=128, out_dtype=jnp.bfloat16,
                                  out_layout="NHWC")
    out_fast = jax.block_until_ready(out_fast)
    assert out_fast.shape == (N, H, W, Cout) and out_fast.dtype == jnp.bfloat16
    ref_nhwc = jnp.transpose(ref, (0, 2, 3, 1))
    assert jnp.allclose(out_fast.astype(jnp.float32), ref_nhwc,
                        atol=6e-2, rtol=6e-2)

    # 1c) linear=True variant (no PReLU epilogue / alpha stream).
    ref_lin = _reference(x, conv_w, bn_gamma, bn_beta, bn_mean, bn_var,
                         prelu_alpha, k=k, s=s, p=p, linear=True)
    out_lin = conv_block_forward(x, conv_w, bn_gamma, bn_beta, bn_mean, bn_var,
                                 None, k=k, s=s, p=p, linear=True,
                                 compute_dtype=jnp.float32)
    out_lin = jax.block_until_ready(out_lin)
    assert jnp.allclose(out_lin, ref_lin, atol=1e-4, rtol=1e-4)

    # ---- Case 2: Cout > 128 (two Cout tiles) + shared scalar PReLU alpha ----
    N2, Cin2, H2, W2, Cout2 = 1, 8, 8, 8, 160
    keys2 = jax.random.split(key, 8)
    x2 = jax.random.normal(keys2[0], (N2, Cin2, H2, W2), jnp.float32)
    w2 = jax.random.normal(keys2[1], (Cout2, Cin2, 3, 3), jnp.float32) * 0.1
    g2 = 1.0 + 0.1 * jax.random.normal(keys2[2], (Cout2,), jnp.float32)
    b2 = 0.1 * jax.random.normal(keys2[3], (Cout2,), jnp.float32)
    m2 = 0.1 * jax.random.normal(keys2[4], (Cout2,), jnp.float32)
    v2 = jnp.abs(jax.random.normal(keys2[5], (Cout2,), jnp.float32)) + 0.5
    a2 = jnp.float32(0.25)          # nn.PReLU() default: one shared parameter

    ref2 = _reference(x2, w2, g2, b2, m2, v2, a2,
                      k=3, s=1, p=1, linear=False)
    out2 = conv_block_forward(x2, w2, g2, b2, m2, v2, a2, k=3, s=1, p=1,
                              linear=False, compute_dtype=jnp.float32)
    out2 = jax.block_until_ready(out2)
    assert out2.shape == (N2, Cout2, H2, W2)
    assert jnp.allclose(out2, ref2, atol=1e-4, rtol=1e-4)

    print("KERNEL_OK")
</pallas_src>

<mosaic_0001>
module attributes {stable_mosaic.version = 11 : i64} {
  func.func @_conv_bn_prelu_kernel(%arg0: i32, %arg1: i32, %arg2: i32, %arg3: memref<1x18x18x4xf32, #tpu.memory_space<vmem>>, %arg4: memref<36x128xf32, #tpu.memory_space<vmem>>, %arg5: memref<1x128xf32, #tpu.memory_space<vmem>>, %arg6: memref<1x128xf32, #tpu.memory_space<vmem>>, %arg7: memref<1x8x16x128xf32, #tpu.memory_space<vmem>>, %arg8: memref<128x36xf32, #tpu.memory_space<vmem>>) attributes {dimension_semantics = [#tpu.dimension_semantics<parallel>, #tpu.dimension_semantics<parallel>, #tpu.dimension_semantics<parallel>], iteration_bounds = array<i64: 2, 2, 1>, scalar_prefetch = 0 : i64, scratch_operands = 1 : i64, tpu.core_type = #tpu.core_type<tc>, window_params = [{transform_indices = @transform_0, window_bounds = array<i64: 1, 18, 18, 4>}, {transform_indices = @transform_1, window_bounds = array<i64: 36, 128>}, {transform_indices = @transform_2, window_bounds = array<i64: 1, 128>}, {transform_indices = @transform_3, window_bounds = array<i64: 1, 128>}, {transform_indices = @transform_4, window_bounds = array<i64: 1, 8, 16, 128>}]} {
    %c8_i32 = arith.constant 8 : i32
    %0 = arith.muli %arg1, %c8_i32 : i32
    %1 = tpu.assume_multiple %0, 8 : i32
    %c0_i32 = arith.constant 0 : i32
    %2 = arith.addi %1, %c0_i32 : i32
    %c0 = arith.constant 0 : index
    %3 = arith.index_cast %2 : i32 to index
    %c0_0 = arith.constant 0 : index
    %c0_1 = arith.constant 0 : index
    %4 = vector.load %arg3[%c0, %3, %c0_0, %c0_1] : memref<1x18x18x4xf32, #tpu.memory_space<vmem>>, vector<1x8x18x4xf32>
    %5 = vector.shape_cast %4 : vector<1x8x18x4xf32> to vector<8x18x4xf32>
    %6 = vector.extract_strided_slice %5 {offsets = [0, 0, 0], sizes = [8, 16, 4], strides = [1, 1, 1]} : vector<8x18x4xf32> to vector<8x16x4xf32>
    %7 = vector.shape_cast %6 : vector<8x16x4xf32> to vector<128x4xf32>
    %c0_2 = arith.constant 0 : index
    %c0_3 = arith.constant 0 : index
    %8 = vector.load %arg8[%c0_2, %c0_3] : memref<128x36xf32, #tpu.memory_space<vmem>>, vector<128x4xf32>
    tpu.vector_store %arg8[%c0_2, %c0_3], %7 {strides = array<i32>} : memref<128x36xf32, #tpu.memory_space<vmem>>, vector<128x4xf32>,
    %9 = vector.extract_strided_slice %5 {offsets = [0, 1, 0], sizes = [8, 16, 4], strides = [1, 1, 1]} : vector<8x18x4xf32> to vector<8x16x4xf32>
    %10 = vector.shape_cast %9 : vector<8x16x4xf32> to vector<128x4xf32>
    %c0_4 = arith.constant 0 : index
    %c4 = arith.constant 4 : index
    %11 = vector.load %arg8[%c0_4, %c4] : memref<128x36xf32, #tpu.memory_space<vmem>>, vector<128x4xf32>
    tpu.vector_store %arg8[%c0_4, %c4], %10 {strides = array<i32>} : memref<128x36xf32, #tpu.memory_space<vmem>>, vector<128x4xf32>,
    %12 = vector.extract_strided_slice %5 {offsets = [0, 2, 0], sizes = [8, 16, 4], strides = [1, 1, 1]} : vector<8x18x4xf32> to vector<8x16x4xf32>
    %13 = vector.shape_cast %12 : vector<8x16x4xf32> to vector<128x4xf32>
    %c0_5 = arith.constant 0 : index
    %c8 = arith.constant 8 : index
    %14 = vector.load %arg8[%c0_5, %c8] : memref<128x36xf32, #tpu.memory_space<vmem>>, vector<128x4xf32>
    tpu.vector_store %arg8[%c0_5, %c8], %13 {strides = array<i32>} : memref<128x36xf32, #tpu.memory_space<vmem>>, vector<128x4xf32>,
    %c1_i32 = arith.constant 1 : i32
    %15 = arith.addi %1, %c1_i32 : i32
    %c0_6 = arith.constant 0 : index
    %16 = arith.index_cast %15 : i32 to index
    %c0_7 = arith.constant 0 : index
    %c0_8 = arith.constant 0 : index
    %17 = vector.load %arg3[%c0_6, %16, %c0_7, %c0_8] : memref<1x18x18x4xf32, #tpu.memory_space<vmem>>, vector<1x8x18x4xf32>
    %18 = vector.shape_cast %17 : vector<1x8x18x4xf32> to vector<8x18x4xf32>
    %19 = vector.extract_strided_slice %18 {offsets = [0, 0, 0], sizes = [8, 16, 4], strides = [1, 1, 1]} : vector<8x18x4xf32> to vector<8x16x4xf32>
    %20 = vector.shape_cast %19 : vector<8x16x4xf32> to vector<128x4xf32>
    %c0_9 = arith.constant 0 : index
    %c12 = arith.constant 12 : index
    %21 = vector.load %arg8[%c0_9, %c12] : memref<128x36xf32, #tpu.memory_space<vmem>>, vector<128x4xf32>
    tpu.vector_store %arg8[%c0_9, %c12], %20 {strides = array<i32>} : memref<128x36xf32, #tpu.memory_space<vmem>>, vector<128x4xf32>,
    %22 = vector.extract_strided_slice %18 {offsets = [0, 1, 0], sizes = [8, 16, 4], strides = [1, 1, 1]} : vector<8x18x4xf32> to vector<8x16x4xf32>
    %23 = vector.shape_cast %22 : vector<8x16x4xf32> to vector<128x4xf32>
    %c0_10 = arith.constant 0 : index
    %c16 = arith.constant 16 : index
    %24 = vector.load %arg8[%c0_10, %c16] : memref<128x36xf32, #tpu.memory_space<vmem>>, vector<128x4xf32>
    tpu.vector_store %arg8[%c0_10, %c16], %23 {strides = array<i32>} : memref<128x36xf32, #tpu.memory_space<vmem>>, vector<128x4xf32>,
    %25 = vector.extract_strided_slice %18 {offsets = [0, 2, 0], sizes = [8, 16, 4], strides = [1, 1, 1]} : vector<8x18x4xf32> to vector<8x16x4xf32>
    %26 = vector.shape_cast %25 : vector<8x16x4xf32> to vector<128x4xf32>
    %c0_11 = arith.constant 0 : index
    %c20 = arith.constant 20 : index
    %27 = vector.load %arg8[%c0_11, %c20] : memref<128x36xf32, #tpu.memory_space<vmem>>, vector<128x4xf32>
    tpu.vector_store %arg8[%c0_11, %c20], %26 {strides = array<i32>} : memref<128x36xf32, #tpu.memory_space<vmem>>, vector<128x4xf32>,
    %c2_i32 = arith.constant 2 : i32
    %28 = arith.addi %1, %c2_i32 : i32
    %c0_12 = arith.constant 0 : index
    %29 = arith.index_cast %28 : i32 to index
    %c0_13 = arith.constant 0 : index
    %c0_14 = arith.constant 0 : index
    %30 = vector.load %arg3[%c0_12, %29, %c0_13, %c0_14] : memref<1x18x18x4xf32, #tpu.memory_space<vmem>>, vector<1x8x18x4xf32>
    %31 = vector.shape_cast %30 : vector<1x8x18x4xf32> to vector<8x18x4xf32>
    %32 = vector.extract_strided_slice %31 {offsets = [0, 0, 0], sizes = [8, 16, 4], strides = [1, 1, 1]} : vector<8x18x4xf32> to vector<8x16x4xf32>
    %33 = vector.shape_cast %32 : vector<8x16x4xf32> to vector<128x4xf32>
    %c0_15 = arith.constant 0 : index
    %c24 = arith.constant 24 : index
    %34 = vector.load %arg8[%c0_15, %c24] : memref<128x36xf32, #tpu.memory_space<vmem>>, vector<128x4xf32>
    tpu.vector_store %arg8[%c0_15, %c24], %33 {strides = array<i32>} : memref<128x36xf32, #tpu.memory_space<vmem>>, vector<128x4xf32>,
    %35 = vector.extract_strided_slice %31 {offsets = [0, 1, 0], sizes = [8, 16, 4], strides = [1, 1, 1]} : vector<8x18x4xf32> to vector<8x16x4xf32>
    %36 = vector.shape_cast %35 : vector<8x16x4xf32> to vector<128x4xf32>
    %c0_16 = arith.constant 0 : index
    %c28 = arith.constant 28 : index
    %37 = vector.load %arg8[%c0_16, %c28] : memref<128x36xf32, #tpu.memory_space<vmem>>, vector<128x4xf32>
    tpu.vector_store %arg8[%c0_16, %c28], %36 {strides = array<i32>} : memref<128x36xf32, #tpu.memory_space<vmem>>, vector<128x4xf32>,
    %38 = vector.extract_strided_slice %31 {offsets = [0, 2, 0], sizes = [8, 16, 4], strides = [1, 1, 1]} : vector<8x18x4xf32> to vector<8x16x4xf32>
    %39 = vector.shape_cast %38 : vector<8x16x4xf32> to vector<128x4xf32>
    %c0_17 = arith.constant 0 : index
    %c32 = arith.constant 32 : index
    %40 = vector.load %arg8[%c0_17, %c32] : memref<128x36xf32, #tpu.memory_space<vmem>>, vector<128x4xf32>
    tpu.vector_store %arg8[%c0_17, %c32], %39 {strides = array<i32>} : memref<128x36xf32, #tpu.memory_space<vmem>>, vector<128x4xf32>,
    %c0_18 = arith.constant 0 : index
    %c0_19 = arith.constant 0 : index
    %41 = vector.load %arg8[%c0_18, %c0_19] : memref<128x36xf32, #tpu.memory_space<vmem>>, vector<128x36xf32>
    %c0_20 = arith.constant 0 : index
    %c0_21 = arith.constant 0 : index
    %42 = vector.load %arg4[%c0_20, %c0_21] : memref<36x128xf32, #tpu.memory_space<vmem>>, vector<36x128xf32>
    %cst = arith.constant dense<0.000000e+00> : vector<128x128xf32>
    %43 = tpu.matmul %41, %42, %cst {dimension_numbers = #tpu.dot_dimension_numbers<[1], [0], [0], [1], [0, 0, 1, 1], [], []>} : vector<128x36xf32>, vector<36x128xf32>, vector<128x128xf32> -> vector<128x128xf32>
    %c0_22 = arith.constant 0 : index
    %c0_23 = arith.constant 0 : index
    %44 = vector.load %arg5[%c0_22, %c0_23] : memref<1x128xf32, #tpu.memory_space<vmem>>, vector<1x128xf32>
    %45 = vector.broadcast %44 : vector<1x128xf32> to vector<128x128xf32>
    %46 = arith.addf %43, %45 : vector<128x128xf32>
    %cst_24 = arith.constant 0.000000e+00 : f32
    %47 = vector.broadcast %cst_24 : f32 to vector<128x128xf32>
    %48 = arith.cmpf ogt, %46, %47 : vector<128x128xf32>
    %c0_25 = arith.constant 0 : index
    %c0_26 = arith.constant 0 : index
    %49 = vector.load %arg6[%c0_25, %c0_26] : memref<1x128xf32, #tpu.memory_space<vmem>>, vector<1x128xf32>
    %50 = vector.broadcast %49 : vector<1x128xf32> to vector<128x128xf32>
    %51 = arith.mulf %50, %46 : vector<128x128xf32>
    %52 = arith.select %48, %46, %51 : vector<128x128xi1>, vector<128x128xf32>
    %53 = vector.shape_cast %52 : vector<128x128xf32> to vector<8x16x128xf32>
    %c0_27 = arith.constant 0 : index
    %c0_28 = arith.constant 0 : index
    %c0_29 = arith.constant 0 : index
    %c0_30 = arith.constant 0 : index
    %54 = vector.load %arg7[%c0_27, %c0_28, %c0_29, %c0_30] : memref<1x8x16x128xf32, #tpu.memory_space<vmem>>, vector<1x8x16x128xf32>
    %55 = vector.shape_cast %54 : vector<1x8x16x128xf32> to vector<8x16x128xf32>
    %56 = vector.shape_cast %53 : vector<8x16x128xf32> to vector<1x8x16x128xf32>
    tpu.vector_store %arg7[%c0_27, %c0_28, %c0_29, %c0_30], %56 {strides = array<i32>} : memref<1x8x16x128xf32, #tpu.memory_space<vmem>>, vector<1x8x16x128xf32>,
    return
  }
  func.func @transform_0(%arg0: i32, %arg1: i32, %arg2: i32) -> (i32, i32, i32, i32) {
    %c0_i32 = arith.constant 0 : i32
    %c0_i32_0 = arith.constant 0 : i32
    %c0_i32_1 = arith.constant 0 : i32
    %c0_i32_2 = arith.constant 0 : i32
    return %arg0, %c0_i32, %c0_i32_0, %c0_i32_1 : i32, i32, i32, i32
  }
  func.func @transform_1(%arg0: i32, %arg1: i32, %arg2: i32) -> (i32, i32) {
    %c0_i32 = arith.constant 0 : i32
    %c0_i32_0 = arith.constant 0 : i32
    return %c0_i32, %arg2 : i32, i32
  }
  func.func @transform_2(%arg0: i32, %arg1: i32, %arg2: i32) -> (i32, i32) {
    %c0_i32 = arith.constant 0 : i32
    %c0_i32_0 = arith.constant 0 : i32
    return %c0_i32, %arg2 : i32, i32
  }
  func.func @transform_3(%arg0: i32, %arg1: i32, %arg2: i32) -> (i32, i32) {
    %c0_i32 = arith.constant 0 : i32
    %c0_i32_0 = arith.constant 0 : i32
    return %c0_i32, %arg2 : i32, i32
  }
  func.func @transform_4(%arg0: i32, %arg1: i32, %arg2: i32) -> (i32, i32, i32, i32) {
    %c0_i32 = arith.constant 0 : i32
    %c0_i32_0 = arith.constant 0 : i32
    return %arg0, %arg1, %c0_i32, %arg2 : i32, i32, i32, i32
  }
}

</mosaic_0001>

<bundles_post_ra>
// kernel: tpu_custom_call.1
= control target key start
LH: loop header
LB: loop body
LE: loop exit
PB: predicated region body
PF: predicated region fallthrough
CT: control target
= control target key end

     0   :  { %9 = vsyncpa [#allocation4], 0  ;;  %s2826_s0 = inlined_call_operand.vmem [shape: f32[2,18,18,4], index: 0, kind: input, shape index: {}]   ;;  %s2827_s1 = inlined_call_operand.vmem [shape: f32[36,128], index: 1, kind: input, shape index: {}]   ;;  %s2828_s2 = inlined_call_operand.vmem [shape: f32[1,128], index: 2, kind: input, shape index: {}]   ;;  %s2829_s3 = inlined_call_operand.vmem [shape: f32[1,128], index: 3, kind: input, shape index: {}]   ;;  %s2830_s4 = inlined_call_operand.hbm [shape: f32[2,16,16,128], index: 4, kind: output, shape index: {}]  }
   0x1   :  { %11 = vsyncpa [#allocation4 + $0x1], 0  ;;  %s2013_s15 = smov 0   ;;  %s2015_s16 = smov 0  }
   0x2   :  { %s2017_s17 = smov 0   ;;  %s2019_s18 = smov 0  }
   0x3   :  { %s2021_s19 = smov 0   ;;  %s2023_s20 = smov 0  }
   0x4   :  { %s2025_s21 = smov 0   ;;  %s2027_s22 = smov 0  }
   0x5 LB: > { %s1641_s23 = sadd.s32 4294967295, %s1976_s22   ;;  %s1642_s24 = sadd.s32 4294967294, %s1976_s22   ;;  %s1976_s22 = sphi %s2027_s22, %s17_s22   ;;  %s1972_s21 = sphi %s2025_s21, %s2845_s21   ;;  %s1968_s20 = sphi %s2023_s20, %s2844_s20   ;;  %s1964_s19 = sphi %s2021_s19, %s2843_s19   ;;  %s1960_s18 = sphi %s2019_s18, %s2842_s18   ;;  %s1956_s17 = sphi %s2017_s17, %s2841_s17   ;;  %s1952_s16 = sphi %s2015_s16, %s2840_s16   ;;  %s1948_s15 = sphi %s2013_s15, %s2839_s15  }
   0x6   : > { %s32_s25 = sadd.s32 1, %s1968_s20  ;;  %s36_s26 = sadd.s32 1, %s1972_s21 }
   0x7   : > { %p34_p0 = scmp.ge.s32.totalorder %s32_s25, 2  ;;  %p161_p1 = scmp.ne.s32.totalorder %s1956_s17, %s1952_s16 }
   0x8   : > { %p162_p2 = scmp.eq.s32.totalorder %s1641_s23, 3  ;;  %p167_p5 = scmp.ne.s32.totalorder %s1952_s16, %s1948_s15 }
   0x9   : > { %s2847_s25 = smov (%p34_p0, %s32_s25), 0  ;;  %s2849_s26 = smov (!%p34_p0, %s36_s26), %s1972_s21 }
   0xa   : > { %s145_s27 = ssub.s32 %s1968_s20, %s2847_s25  ;;  %p2064_p3 = por %p162_p2, %p161_p1 }
   0xb   : > { %p38_p4 = scmp.ge.s32.totalorder %s2849_s26, 2  ;;  %p168_p6 = scmp.eq.s32.totalorder %s1642_s24, 3 }
   0xc   : > { %p1648_p7 = scmp.ge.s32.totalorder %s1976_s22, 1  ;;  %p213_p9 = scmp.lt.s32.totalorder %s1976_s22, 5 }
   0xd   : > { %s2851_s26 = smov (%p38_p4, %s2849_s26), 0  ;;  %p2073_p8 = por %p168_p6, %p167_p5 }
   0xe   : > { %s144_s30 = ssub.s32 %s1972_s21, %s2851_s26  ;;  %s151_s5 = sadd.s32 1, %s1956_s17 }
   0xf   : > { %s146_s6 = sor.u32 %s145_s27, %s144_s30  ;;  %p214_p10 = pnand %p1648_p7, %p213_p9 }
  0x10   : > { %p149_p11 = scmp.eq.s32.totalorder %s146_s6, 0  ;;  %p249_p12 = scmp.lt.s32.totalorder (!%p214_p10), %s1964_s19, 1  ;;  %vm292_vm0 = vcmask (!%p214_p10), 31744   ;;  %vm333_vm1 = vcmask (!%p214_p10), 1046528   ;;  %vm439_vm2 = vcmask (!%p214_p10), 1045504   ;;  %vm1274_vm3 = vcmask (!%p214_p10), 1043456  }
  0x11   : > { %217 = sbr.rel (%p214_p10) target bundleno = 643 (0x283), region = 36  ;;  %s1978_s23 = smov (!%p214_p10), 4   ;;  %vm422_vm4 = vcmask (!%p214_p10), 64544   ;;  %vm528_vm5 = vcmask (!%p214_p10), 97344   ;;  %vm636_vm6 = vcmask (!%p214_p10), 130144   ;;  %vm749_vm7 = vcmask (!%p214_p10), 162944  }
  0x12   : > { %s2082_s7 = scalar_select %p149_p11, %s1956_s17, %s151_s5  }
  0x13   : > { %s1652_s9 = smul.u32 (!%p214_p10), 192, %s1960_s18  ;;  %s1979_s24 = smov (!%p214_p10), 8   ;;  %vm854_vm8 = vcmask (!%p214_p10), 195744   ;;  %vm962_vm9 = vcmask (!%p214_p10), 228544   ;;  %vm1075_vm10 = vcmask (!%p214_p10), 261344   ;;  %vm1180_vm11 = vcmask (!%p214_p10), 294144  }
  0x14   : > { %s2833_s27 = smov (!%p214_p10), 12   ;;  %s1981_s30 = smov (!%p214_p10), 16   ;;  %vm1225_vm12 = vcmask (!%p214_p10), 293888  }
  0x15   : > { %s1982_s5 = smov (!%p214_p10), 20   ;;  %s1983_s6 = smov (!%p214_p10), 24  }
  0x16   : > { %s2837_s11 = smov (!%p214_p10), 12   ;;  %s2838_s12 = smov (!%p214_p10), 28  }
  0x18   : > { %s250_s8 = scalar_select %p249_p12, %s1964_s19, 1 }
  0x1a   : > { %s1801_s10 = smul.u32 432, %s250_s8  ;;  %s2831_s8 = smov 28  }
  0x1c   : > { %s253_s13 = scalar_lea.vmem %s2826_s0, %s1801_s10  ;;  %s1731_s10 = sshll.u32 %s1960_s18, 4 }
  0x1d   : > { %s2090_s14 = scalar_lea.vmem %s253_s13, %s1652_s9  ;;  %s1985_s13 = smov 32  }
  0x1e   : > { %v2093_v0 = vld [vmem:[%s2090_s14 + $0x8] sm:$0xff]  ;;  %v2096_v1 = vld [vmem:[%s2090_s14 + $0x10] sm:$0x3]  ;;  %v268_v2 = vld [vmem:[%s2090_s14] sm:$0xff] }
  0x1f   : > { %v335_v3 = vrot.slane %v2093_v0, 1  ;;  %v337_v4 = vrot.slane %v2096_v1, 1  ;;  %v334_v5 = vrot.slane %v268_v2, 1  ;;  %v2102_v6 = vld [vmem:[%s2090_s14 + $0x68] sm:$0xff]  ;;  %v282_v7 = vld [vmem:[%s2090_s14 + $0x70] sm:$0x3] }
  0x20   : > { %294 = vst.msk [vmem:[#allocation2 + $0x8] sm:$0xff] %vm292_vm0, %v2093_v0  ;;  %293 = vst.msk [vmem:[#allocation2] sm:$0xff] %vm292_vm0, %v268_v2  ;;  %v2109_v8 = vrot.slane %v2102_v6, 1  ;;  %v357_v9 = vrot.slane %v282_v7, 1  ;;  %v2112_v10 = vld [vmem:[%s2090_s14 + $0x60] sm:$0xff]  ;;  %v2115_v11 = vld [vmem:[%s2090_s14 + $0x78] sm:$0xff] }
  0x21   : > { %302 = vst.msk [vmem:[#allocation2 + $0x48] sm:$0xff] %vm292_vm0, %v2102_v6  ;;  %v338_v12 = vsel %vm333_vm1, %v335_v3, %v337_v4  ;;  %v336_v13 = vsel %vm333_vm1, %v334_v5, %v335_v3  ;;  %v354_v14 = vrot.slane %v2112_v10, 1  ;;  %v2123_v15 = vld [vmem:[%s2090_s14 + $0x18] sm:$0xff]  ;;  %v2126_v16 = vld [vmem:[%s2090_s14 + $0x80] sm:$0xff]  ;;  %301 = vst.msk [vmem:[#allocation2 + $0x40] sm:$0xff] %vm292_vm0, %v2112_v10  ;;  %v2138_v18 = vrot.slane %v2102_v6, 2 }
  0x22   : > { %v2129_v17 = vld [vmem:[%s2090_s14 + $0x20] sm:$0xff]  ;;  %303 = vst.msk [vmem:[#allocation2 + $0x50] sm:$0xff] %vm292_vm0, %v2115_v11  ;;  %376 = vrot.lane.b32.xlu1 %v338_v12, %s1978_s23  ;;  %374 = vrot.lane.b32.xlu0 %v336_v13, %s1978_s23  ;;  %v440_v19 = vrot.slane %v268_v2, 2  ;;  %v2141_v20 = vld [vmem:[%s2090_s14 + $0x90] sm:$0xff]  ;;  %295 = vst.msk [vmem:[#allocation2 + $0x10] sm:$0xff] %vm292_vm0, %v2123_v15  ;;  %v358_v21 = vsel %vm333_vm1, %v2109_v8, %v357_v9  ;;  %v460_v23 = vrot.slane %v2112_v10, 2 }
  0x23   : > { %296 = vst.msk [vmem:[#allocation2 + $0x18] sm:$0xff] %vm292_vm0, %v2129_v17  ;;  %304 = vst.msk [vmem:[#allocation2 + $0x58] sm:$0xff] %vm292_vm0, %v2126_v16  ;;  %v2153_v22 = vsel %vm333_vm1, %v354_v14, %v2109_v8  ;;  %v441_v24 = vrot.slane %v2093_v0, 2  ;;  %v2160_v25 = vld [vmem:[%s2090_s14 + $0x30] sm:$0xff]  ;;  %v2163_v26 = vld [vmem:[%s2090_s14 + $0x98] sm:$0xff]  ;;  %v463_v31 = vrot.slane %v282_v7, 2 }
  0x24   : > { %305 = vst.msk [vmem:[#allocation2 + $0x60] sm:$0xff] %vm292_vm0, %v2141_v20  ;;  %v2166_v27 = vld [vmem:[%s2090_s14 + $0x38] sm:$0xff]  ;;  %297 = vst.msk [vmem:[#allocation2 + $0x20] sm:$0xff] %vm292_vm0, %v2160_v25  ;;  %v2173_v28 = vld [vmem:[%s2090_s14 + $0xa8] sm:$0xff]  ;;  %v2184_v29 = vsel %vm439_vm2, %v460_v23, %v2138_v18  ;;  %v443_v32 = vrot.slane %v2096_v1, 2  ;;  %v681_v38 = vrot.slane %v2115_v11, 1 }
  0x25   : > { %306 = vst.msk [vmem:[#allocation2 + $0x68] sm:$0xff] %vm292_vm0, %v2163_v26  ;;  %298 = vst.msk [vmem:[#allocation2 + $0x28] sm:$0xff] %vm292_vm0, %v2166_v27  ;;  %v442_v30 = vsel %vm439_vm2, %v440_v19, %v441_v24  ;;  %v2189_v33 = vld [vmem:[%s2090_s14 + $0x48] sm:$0xff]  ;;  %v2194_v34 = vld [vmem:[%s2090_s14 + $0xb0] sm:$0xff]  ;;  %v464_v36 = vsel %vm439_vm2, %v2138_v18, %v463_v31  ;;  %v661_v39 = vrot.slane %v2123_v15, 1  ;;  %v682_v40 = vrot.slane %v2126_v16, 1 }
  0x26   : > { %392 = vrot.lane.b32.xlu1 %v358_v21, %s1978_s23  ;;  %390 = vrot.lane.b32.xlu0 %v2153_v22, %s1978_s23  ;;  %307 = vst.msk [vmem:[#allocation2 + $0x70] sm:$0xff] %vm292_vm0, %v2173_v28  ;;  %299 = vst.msk [vmem:[#allocation2 + $0x30] sm:$0xff] %vm292_vm0, %v2189_v33  ;;  %v2197_v35 = vld [vmem:[%s2090_s14 + $0x50] sm:$0xff]  ;;  %v444_v37 = vsel %vm439_vm2, %v441_v24, %v443_v32  ;;  %v662_v41 = vrot.slane %v2129_v17, 1  ;;  %v1669_v44 = vld [vmem:[%s2090_s14 + $0x88] sm:$0x3] }
  0x27   : > { %308 = vst.msk [vmem:[#allocation2 + $0x78] sm:$0xff] %vm292_vm0, %v2194_v34  ;;  %300 = vst.msk [vmem:[#allocation2 + $0x38] sm:$0xff] %vm292_vm0, %v2197_v35  ;;  %v683_v42 = vsel %vm333_vm1, %v681_v38, %v682_v40  ;;  %v1657_v45 = vld [vmem:[%s2090_s14 + $0x28] sm:$0x3]  ;;  %v684_v46 = vrot.slane %v1669_v44, 1  ;;  %v786_v48 = vrot.slane %v2115_v11, 2 }
  0x28   : > { %v663_v43 = vsel %vm333_vm1, %v661_v39, %v662_v41  ;;  %v664_v47 = vrot.slane %v1657_v45, 1  ;;  %v766_v49 = vrot.slane %v2123_v15, 2  ;;  %v787_v50 = vrot.slane %v2126_v16, 2  ;;  %v285_v54 = vld [vmem:[%s2090_s14 + $0x88] sm:$0x3] }
  0x29   : > { %v767_v51 = vrot.slane %v2129_v17, 2  ;;  %v685_v52 = vsel %vm333_vm1, %v682_v40, %v684_v46  ;;  %v273_v55 = vld [vmem:[%s2090_s14 + $0x28] sm:$0x3]  ;;  %v362_v58 = vrot.slane %v285_v54, 1  ;;  %v789_v62 = vrot.slane %v1669_v44, 2 }
  0x2a   : > { %496 = vrot.lane.b32.xlu1 %v2184_v29, %s1979_s24  ;;  %480 = vrot.lane.b32.xlu0 %v442_v30, %s1979_s24  ;;  %v665_v53 = vsel %vm333_vm1, %v662_v41, %v664_v47  ;;  %v788_v56 = vsel %vm439_vm2, %v786_v48, %v787_v50  ;;  %v342_v59 = vrot.slane %v273_v55, 1  ;;  %v769_v63 = vrot.slane %v1657_v45, 2  ;;  %v1217_v46 = vld [vmem:[%s2827_s1 + $0x20] sm:$0xf] }
  0x2b   : > { %v768_v57 = vsel %vm439_vm2, %v766_v49, %v767_v51  ;;  %v363_v60 = vsel %vm333_vm1, %v682_v40, %v362_v58  ;;  %v790_v0 = vsel %vm439_vm2, %v787_v50, %v789_v62  ;;  %v468_v2 = vrot.slane %v285_v54, 2  ;;  %v288_v49 = vld [vmem:[%s2090_s14 + $0xa0] sm:$0x3] }
  0x2c   : > { %v343_v61 = vsel %vm333_vm1, %v662_v41, %v342_v59  ;;  %v770_v1 = vsel %vm439_vm2, %v767_v51, %v769_v63  ;;  %v448_v3 = vrot.slane %v273_v55, 2  ;;  %v1007_v7 = vrot.slane %v2141_v20, 1  ;;  %v1215_v41 = vld [vmem:[%s2827_s1 + $0x10] sm:$0xff] }
  0x2d   : > { %v469_v4 = vsel %vm439_vm2, %v787_v50, %v468_v2  ;;  %v987_v9 = vrot.slane %v2160_v25, 1  ;;  %v2273_v12 = vrot.slane %v2166_v27, 1  ;;  %v1112_v21 = vrot.slane %v2141_v20, 2  ;;  %v276_v50 = vld [vmem:[%s2090_s14 + $0x40] sm:$0x3] }
  0x2e   : > { %498 = vrot.lane.b32.xlu1 %v464_v36, %s1979_s24  ;;  %482 = vrot.lane.b32.xlu0 %v444_v37, %s1979_s24  ;;  %v449_v5 = vsel %vm439_vm2, %v767_v51, %v448_v3  ;;  %v1092_v23 = vrot.slane %v2160_v25, 2  ;;  %v2296_v24 = vrot.slane %v2163_v26, 2  ;;  %v2299_v30 = vrot.slane %v2166_v27, 2  ;;  %v1660_v36 = vld [vmem:[%s2090_s14 + $0x40] sm:$0x3]  ;;  %v1214_v37 = vld [vmem:[%s2827_s1 + $0x8] sm:$0xff] }
  0x2f   : > { %v989_v14 = vsel %vm333_vm1, %v987_v9, %v2273_v12  ;;  %v669_v40 = vrot.slane %v1660_v36, 1  ;;  %v347_v54 = vrot.slane %v276_v50, 1  ;;  %v774_v58 = vrot.slane %v1660_v36, 2 }
  0x30   : > { %v453_v62 = vrot.slane %v276_v50, 2  ;;  %v1012_v9 = vrot.slane %v2173_v28, 1  ;;  %v1117_v36 = vrot.slane %v2173_v28, 2 }
  0x31   : > { %v670_v45 = vsel %vm333_vm1, %v2273_v12, %v669_v40 }
  0x32   : > { %604 = vrot.lane.b32.xlu1 %v2115_v11, %s2833_s27  ;;  %588 = vrot.lane.b32.xlu0 %v2123_v15, %s2833_s27  ;;  %v2270_v11 = vrot.slane %v2163_v26, 1  ;;  %v1695_v15 = vld [vmem:[%s2090_s14 + $0xa0] sm:$0x3]  ;;  %v454_v2 = vsel %vm439_vm2, %v2299_v30, %v453_v62 }
  0x33   : > { %v1115_v47 = vrot.slane %v1695_v15, 2 }
  0x34   : > { %v1009_v13 = vsel %vm333_vm1, %v1007_v7, %v2270_v11 }
  0x35   : > { %v1116_v51 = vsel %vm439_vm2, %v2296_v24, %v1115_v47 }
  0x36   : > { %606 = vrot.lane.b32.xlu1 %v2126_v16, %s2833_s27  ;;  %590 = vrot.lane.b32.xlu0 %v2129_v17, %s2833_s27  ;;  %v1683_v16 = vld [vmem:[%s2090_s14 + $0x40] sm:$0x3]  ;;  %v1010_v17 = vrot.slane %v1695_v15, 1 }
  0x37   : > { %v990_v19 = vrot.slane %v1683_v16, 1  ;;  %v1095_v48 = vrot.slane %v1683_v16, 2 }
  0x38   : > { %v1011_v31 = vsel %vm333_vm1, %v2270_v11, %v1010_v17 }
  0x39   : > { %v991_v32 = vsel %vm333_vm1, %v2273_v12, %v990_v19 }
  0x3a   : > { %717 = vrot.lane.b32.xlu1 %v683_v42, %s1981_s30  ;;  %701 = vrot.lane.b32.xlu0 %v663_v43, %s1981_s30 }
  0x3e   : > { %394 = vrot.lane.b32.xlu1 %v683_v42, %s1978_s23  ;;  %378 = vrot.lane.b32.xlu0 %v663_v43, %s1978_s23  ;;  %v1216_v42 = vld [vmem:[%s2827_s1 + $0x18] sm:$0xff] }
  0x3f   : > { %v1791_v43 = vpack.c.bf16 %v1216_v42, %v1215_v41 }
  0x42   : > { %719 = vrot.lane.b32.xlu1 %v685_v52, %s1981_s30  ;;  %703 = vrot.lane.b32.xlu0 %v665_v53, %s1981_s30  ;;  %v1096_v52 = vsel %vm439_vm2, %v2299_v30, %v1095_v48  ;;  %v367_v53 = vrot.slane %v288_v49, 1 }
  0x44   : > { %v368_v55 = vsel %vm333_vm1, %v2270_v11, %v367_v53 }
  0x46   : > { %822 = vrot.lane.b32.xlu1 %v788_v56, %s1982_s5  ;;  %806 = vrot.lane.b32.xlu0 %v768_v57, %s1982_s5 }
  0x4a   : > { %396 = vrot.lane.b32.xlu1 %v363_v60, %s1978_s23  ;;  %380 = vrot.lane.b32.xlu0 %v343_v61, %s1978_s23  ;;  %v775_v60 = vsel %vm439_vm2, %v2299_v30, %v774_v58  ;;  %v473_v61 = vrot.slane %v288_v49, 2  ;;  %v279_v58 = vld [vmem:[%s2090_s14 + $0x58] sm:$0x3] }
  0x4b   : > { %v352_v62 = vrot.slane %v279_v58, 1 }
  0x4e   : > { %500 = vrot.lane.b32.xlu1 %v788_v56, %s1979_s24  ;;  %484 = vrot.lane.b32.xlu0 %v768_v57, %s1979_s24  ;;  %v348_v56 = vsel %vm333_vm1, %v2273_v12, %v347_v54  ;;  %v2385_v12 = vrot.slane %v2194_v34, 1 }
  0x50   : > { %v1014_v16 = vsel %vm333_vm1, %v1012_v9, %v2385_v12 }
  0x52   : > { %824 = vrot.lane.b32.xlu1 %v790_v0, %s1982_s5  ;;  %808 = vrot.lane.b32.xlu0 %v770_v1, %s1982_s5  ;;  %v474_v1 = vsel %vm439_vm2, %v2296_v24, %v473_v61 }
  0x56   : > { %930 = vrot.lane.b32.xlu1 %v2141_v20, %s1983_s6  ;;  %914 = vrot.lane.b32.xlu0 %v2160_v25, %s1983_s6 }
  0x5a   : > { %502 = vrot.lane.b32.xlu1 %v469_v4, %s1979_s24  ;;  %486 = vrot.lane.b32.xlu0 %v449_v5, %s1979_s24 }
  0x5e   : > { %608 = vrot.lane.b32.xlu1 %v2141_v20, %s2833_s27  ;;  %592 = vrot.lane.b32.xlu0 %v2160_v25, %s2833_s27  ;;  %v1114_v20 = vsel %vm439_vm2, %v1112_v21, %v2296_v24  ;;  %v1094_v25 = vsel %vm439_vm2, %v1092_v23, %v2299_v30  ;;  %v2405_v30 = vld [vmem:[%s2090_s14 + $0xb8] sm:$0x3] }
  0x5f   : > { %v1120_v53 = vrot.slane %v2405_v30, 2 }
  0x62   : > { %932 = vrot.lane.b32.xlu1 %v2163_v26, %s1983_s6  ;;  %916 = vrot.lane.b32.xlu0 %v2166_v27, %s1983_s6 }
  0x66   : > { %1043 = vrot.lane.b32.xlu1 %v1009_v13, %s2831_s8  ;;  %1027 = vrot.lane.b32.xlu0 %v989_v14, %s2831_s8 }
  0x6a   : > { %610 = vrot.lane.b32.xlu1 %v2163_v26, %s2833_s27  ;;  %594 = vrot.lane.b32.xlu0 %v2166_v27, %s2833_s27  ;;  %v1672_v26 = vld [vmem:[%s2090_s14 + $0xa0] sm:$0x3]  ;;  %s1727_s27 = sshll.u32 %s1964_s19, 5 }
  0x6b   : > { %v1213_v27 = vld [vmem:[%s2827_s1] sm:$0xff]  ;;  %v689_v39 = vrot.slane %v1672_v26, 1  ;;  %v794_v57 = vrot.slane %v1672_v26, 2 }
  0x6c   : > { %v1787_v38 = vpack.c.bf16 %v1214_v37, %v1213_v27  ;;  %v1097_v27 = vrot.slane %v2189_v33, 2  ;;  %v2425_v37 = vrot.slane %v2194_v34, 2 }
  0x6d   : > { %v690_v44 = vsel %vm333_vm1, %v2270_v11, %v689_v39  ;;  %v795_v59 = vsel %vm439_vm2, %v2296_v24, %v794_v57  ;;  %v992_v11 = vrot.slane %v2189_v33, 1  ;;  %v291_v57 = vld [vmem:[%s2090_s14 + $0xb8] sm:$0x3] }
  0x6e   : > { %721 = vrot.lane.b32.xlu1 %v1009_v13, %s1981_s30  ;;  %705 = vrot.lane.b32.xlu0 %v989_v14, %s1981_s30  ;;  %v372_v61 = vrot.slane %v291_v57, 1 }
  0x6f   : > { %1788 = vmatprep.subr.bf16.mxu0 %v1787_v38  ;;  %1795 = vmatprep.subr.bf16.mxu1 %v1787_v38 }
  0x70   : > { %1790 = vmatpush3.bf16.msra.mxu0 %v1787_v38  ;;  %1798 = vmatpush3.bf16.msra.mxu1 %v1787_v38  ;;  %v2428_v38 = vrot.slane %v2197_v35, 2 }
  0x71   : > { %1792 = vmatprep.subr.bf16.mxu0 %v1791_v43  ;;  %1796 = vmatprep.subr.bf16.mxu1 %v1791_v43 }
  0x72   : > { %1045 = vrot.lane.b32.xlu1 %v1011_v31, %s2831_s8  ;;  %1029 = vrot.lane.b32.xlu0 %v991_v32, %s2831_s8  ;;  %v2408_v31 = vld [vmem:[%s2090_s14 + $0x58] sm:$0x3]  ;;  %v1015_v32 = vrot.slane %v2405_v30, 1  ;;  %s1509_s8 = sadd.s32 %s1731_s10, %s1727_s27 }
  0x73   : > { %v1100_v54 = vrot.slane %v2408_v31, 2 }
  0x74   : > { %1794 = vmatpush3.bf16.msra.mxu0 %v1791_v43  ;;  %1799 = vmatpush3.bf16.msra.mxu1 %v1791_v43  ;;  %v1016_v39 = vsel %vm333_vm1, %v2385_v12, %v1015_v32  ;;  %v1675_v43 = vld [vmem:[%s2090_s14 + $0xb8] sm:$0x3] }
  0x75   : > { %1761 = vmatprep.subr.msk.mxu0 %vm1274_vm3, %v1217_v46  ;;  %1797 = vmatprep.subr.msk.mxu1 %vm1274_vm3, %v1217_v46 }
  0x76   : > { %1148 = vrot.lane.b32.xlu1 %v1114_v20, %s1985_s13  ;;  %1132 = vrot.lane.b32.xlu0 %v1094_v25, %s1985_s13 }
  0x78   : > { %1762 = vmatpush3.msk.msra.mxu0 %vm1274_vm3, %v1217_v46  ;;  %1800 = vmatpush3.msk.msra.mxu1 %vm1274_vm3, %v1217_v46 }
  0x7a   : > { %398 = vrot.lane.b32.xlu1 %v1009_v13, %s1978_s23  ;;  %382 = vrot.lane.b32.xlu0 %v989_v14, %s1978_s23  ;;  %v2388_v13 = vrot.slane %v2197_v35, 1 }
  0x7c   : > { %v994_v17 = vsel %vm333_vm1, %v992_v11, %v2388_v13 }
  0x7e   : > { %723 = vrot.lane.b32.xlu1 %v690_v44, %s1981_s30  ;;  %707 = vrot.lane.b32.xlu0 %v670_v45, %s1981_s30  ;;  %v1663_v44 = vld [vmem:[%s2090_s14 + $0x58] sm:$0x3]  ;;  %v694_v45 = vrot.slane %v1675_v43, 1 }
  0x7f   : > { %v674_v46 = vrot.slane %v1663_v44, 1 }
  0x80   : > { %v695_v49 = vsel %vm333_vm1, %v2385_v12, %v694_v45 }
  0x81   : > { %v675_v50 = vsel %vm333_vm1, %v2388_v13, %v674_v46 }
  0x82   : > { %826 = vrot.lane.b32.xlu1 %v1114_v20, %s1982_s5  ;;  %810 = vrot.lane.b32.xlu0 %v1094_v25, %s1982_s5 }
  0x86   : > { %1150 = vrot.lane.b32.xlu1 %v1116_v51, %s1985_s13  ;;  %1134 = vrot.lane.b32.xlu0 %v1096_v52, %s1985_s13 }
  0x8a   : > { %400 = vrot.lane.b32.xlu1 %v368_v55, %s1978_s23  ;;  %384 = vrot.lane.b32.xlu0 %v348_v56, %s1978_s23 }
  0x8e   : > { %504 = vrot.lane.b32.xlu1 %v1114_v20, %s1979_s24  ;;  %488 = vrot.lane.b32.xlu0 %v1094_v25, %s1979_s24  ;;  %v995_v20 = vrot.slane %v2408_v31, 1 }
  0x92   : > { %828 = vrot.lane.b32.xlu1 %v795_v59, %s1982_s5  ;;  %812 = vrot.lane.b32.xlu0 %v775_v60, %s1982_s5  ;;  %v1121_v59 = vsel %vm439_vm2, %v2425_v37, %v1120_v53  ;;  %v1101_v60 = vsel %vm439_vm2, %v2428_v38, %v1100_v54  ;;  %v1666_v53 = vld [vmem:[%s2090_s14 + $0x70] sm:$0x3] }
  0x94   : > { %v377_v63 = vpop.permute.xlu1 %376  ;;  %v375_v0 = vpop.permute.xlu0 %374 }
  0x95   : > { %424 = vst.msk [vmem:[#allocation2 + $0x8] sm:$0xff] %vm422_vm4, %v377_v63  ;;  %423 = vst.msk [vmem:[#allocation2] sm:$0xff] %vm422_vm4, %v375_v0 }
  0x96   : > { %934 = vrot.lane.b32.xlu1 %v2173_v28, %s1983_s6  ;;  %918 = vrot.lane.b32.xlu0 %v2189_v33, %s1983_s6 }
  0x98   : > { %v393_v3 = vpop.permute.xlu1 %392  ;;  %v391_v4 = vpop.permute.xlu0 %390 }
  0x99   : > { %432 = vst.msk [vmem:[#allocation2 + $0x48] sm:$0xff] %vm422_vm4, %v393_v3  ;;  %431 = vst.msk [vmem:[#allocation2 + $0x40] sm:$0xff] %vm422_vm4, %v391_v4 }
  0x9a   : > { %506 = vrot.lane.b32.xlu1 %v474_v1, %s1979_s24  ;;  %490 = vrot.lane.b32.xlu0 %v454_v2, %s1979_s24  ;;  %v373_v1 = vsel %vm333_vm1, %v2385_v12, %v372_v61  ;;  %v353_v2 = vsel %vm333_vm1, %v2388_v13, %v352_v62 }
  0x9c   : > { %v497_v5 = vpop.permute.xlu1 %496  ;;  %v481_v7 = vpop.permute.xlu0 %480 }
  0x9d   : > { %537 = vst.msk [vmem:[#allocation2 + $0x40] sm:$0xff] %vm528_vm5, %v497_v5  ;;  %529 = vst.msk [vmem:[#allocation2] sm:$0xff] %vm528_vm5, %v481_v7  ;;  %v799_v5 = vrot.slane %v1675_v43, 2  ;;  %v779_v7 = vrot.slane %v1663_v44, 2 }
  0x9e   : > { %612 = vrot.lane.b32.xlu1 %v2173_v28, %s2837_s11  ;;  %596 = vrot.lane.b32.xlu0 %v2189_v33, %s2837_s11  ;;  %v996_v28 = vsel %vm333_vm1, %v2388_v13, %v995_v20 }
  0x9f   : > { %v800_v12 = vsel %vm439_vm2, %v2425_v37, %v799_v5  ;;  %v780_v13 = vsel %vm439_vm2, %v2428_v38, %v779_v7 }
  0xa0   : > { %v499_v14 = vpop.permute.xlu1 %498  ;;  %v483_v15 = vpop.permute.xlu0 %482 }
  0xa1   : > { %538 = vst.msk [vmem:[#allocation2 + $0x48] sm:$0xff] %vm528_vm5, %v499_v14  ;;  %530 = vst.msk [vmem:[#allocation2 + $0x8] sm:$0xff] %vm528_vm5, %v483_v15 }
  0xa2   : > { %936 = vrot.lane.b32.xlu1 %v2194_v34, %s1983_s6  ;;  %920 = vrot.lane.b32.xlu0 %v2197_v35, %s1983_s6 }
  0xa4   : > { %v605_v19 = vpop.permute.xlu1 %604  ;;  %v589_v21 = vpop.permute.xlu0 %588 }
  0xa5   : > { %645 = vst.msk [vmem:[#allocation2 + $0x40] sm:$0xff] %vm636_vm6, %v605_v19  ;;  %637 = vst.msk [vmem:[#allocation2] sm:$0xff] %vm636_vm6, %v589_v21  ;;  %v458_v19 = vrot.slane %v279_v58, 2 }
  0xa6   : > { %1047 = vrot.lane.b32.xlu1 %v1014_v16, %s2838_s12  ;;  %1031 = vrot.lane.b32.xlu0 %v994_v17, %s2838_s12 }
  0xa7   : > { %v459_v30 = vsel %vm439_vm2, %v2428_v38, %v458_v19 }
  0xa8   : > { %v607_v23 = vpop.permute.xlu1 %606  ;;  %v591_v24 = vpop.permute.xlu0 %590 }
  0xa9   : > { %646 = vst.msk [vmem:[#allocation2 + $0x48] sm:$0xff] %vm636_vm6, %v607_v23  ;;  %638 = vst.msk [vmem:[#allocation2 + $0x8] sm:$0xff] %vm636_vm6, %v591_v24 }
  0xaa   : > { %614 = vrot.lane.b32.xlu1 %v2194_v34, %s2837_s11  ;;  %598 = vrot.lane.b32.xlu0 %v2197_v35, %s2837_s11  ;;  %v1119_v34 = vsel %vm439_vm2, %v1117_v36, %v2425_v37  ;;  %v1099_v35 = vsel %vm439_vm2, %v1097_v27, %v2428_v38 }
  0xac   : > { %v718_v25 = vpop.permute.xlu1 %717  ;;  %v702_v26 = vpop.permute.xlu0 %701 }
  0xad   : > { %758 = vst.msk [vmem:[#allocation2 + $0x40] sm:$0xff] %vm749_vm7, %v718_v25  ;;  %750 = vst.msk [vmem:[#allocation2] sm:$0xff] %vm749_vm7, %v702_v26  ;;  %v1700_v26 = vld [vmem:[%s2090_s14 + $0xc8] sm:$0xff] }
  0xae   : > { %725 = vrot.lane.b32.xlu1 %v1014_v16, %s1981_s30  ;;  %709 = vrot.lane.b32.xlu0 %v994_v17, %s1981_s30  ;;  %v1018_v27 = vrot.slane %v1700_v26, 1  ;;  %v1123_v46 = vrot.slane %v1700_v26, 2 }
  0xb0   : > { %v395_v40 = vpop.permute.xlu1 %394  ;;  %v379_v33 = vpop.permute.xlu0 %378 }
  0xb1   : > { %433 = vst.msk [vmem:[#allocation2 + $0x50] sm:$0xff] %vm422_vm4, %v395_v40  ;;  %425 = vst.msk [vmem:[#allocation2 + $0x10] sm:$0xff] %vm422_vm4, %v379_v33 }
  0xb2   : > { %1049 = vrot.lane.b32.xlu1 %v1016_v39, %s2838_s12  ;;  %1033 = vrot.lane.b32.xlu0 %v996_v28, %s2838_s12 }
  0xb4   : > { %v720_v41 = vpop.permute.xlu1 %719  ;;  %v704_v42 = vpop.permute.xlu0 %703 }
  0xb5   : > { %759 = vst.msk [vmem:[#allocation2 + $0x48] sm:$0xff] %vm749_vm7, %v720_v41  ;;  %751 = vst.msk [vmem:[#allocation2 + $0x8] sm:$0xff] %vm749_vm7, %v704_v42 }
  0xb6   : > { %1152 = vrot.lane.b32.xlu1 %v1119_v34, %s1985_s13  ;;  %1136 = vrot.lane.b32.xlu0 %v1099_v35, %s1985_s13 }
  0xb8   : > { %v823_v47 = vpop.permute.xlu1 %822  ;;  %v807_v48 = vpop.permute.xlu0 %806 }
  0xb9   : > { %863 = vst.msk [vmem:[#allocation2 + $0x40] sm:$0xff] %vm854_vm8, %v823_v47  ;;  %855 = vst.msk [vmem:[#allocation2] sm:$0xff] %vm854_vm8, %v807_v48  ;;  %v1678_v48 = vld [vmem:[%s2090_s14 + $0xd0] sm:$0x3] }
  0xba   : > { %402 = vrot.lane.b32.xlu1 %v1014_v16, %s1978_s23  ;;  %386 = vrot.lane.b32.xlu0 %v994_v17, %s1978_s23  ;;  %v2497_v16 = vld [vmem:[%s2090_s14 + $0xc0] sm:$0xff]  ;;  %v478_v17 = vrot.slane %v291_v57, 2  ;;  %v699_v54 = vrot.slane %v1678_v48, 1 }
  0xbb   : > { %v1017_v36 = vrot.slane %v2497_v16, 1  ;;  %v1122_v45 = vrot.slane %v2497_v16, 2 }
  0xbc   : > { %v397_v51 = vpop.permute.xlu1 %396  ;;  %v381_v52 = vpop.permute.xlu0 %380  ;;  %v479_v24 = vsel %vm439_vm2, %v2425_v37, %v478_v17  ;;  %v700_v58 = vsel %vm333_vm1, %v1018_v27, %v699_v54 }
  0xbd   : > { %434 = vst.msk [vmem:[#allocation2 + $0x58] sm:$0xff] %vm422_vm4, %v397_v51  ;;  %426 = vst.msk [vmem:[#allocation2 + $0x18] sm:$0xff] %vm422_vm4, %v381_v52  ;;  %v1019_v39 = vsel %vm333_vm1, %v1017_v36, %v1018_v27 }
  0xbe   : > { %727 = vrot.lane.b32.xlu1 %v695_v49, %s1981_s30  ;;  %711 = vrot.lane.b32.xlu0 %v675_v50, %s1981_s30 }
  0xc0   : > { %v501_v55 = vpop.permute.xlu1 %500  ;;  %v485_v56 = vpop.permute.xlu0 %484 }
  0xc1   : > { %539 = vst.msk [vmem:[#allocation2 + $0x50] sm:$0xff] %vm528_vm5, %v501_v55  ;;  %531 = vst.msk [vmem:[#allocation2 + $0x10] sm:$0xff] %vm528_vm5, %v485_v56  ;;  %v679_v55 = vrot.slane %v1666_v53, 1 }
  0xc2   : > { %830 = vrot.lane.b32.xlu1 %v1119_v34, %s1982_s5  ;;  %814 = vrot.lane.b32.xlu0 %v1099_v35, %s1982_s5 }
  0xc4   : > { %v825_v63 = vpop.permute.xlu1 %824  ;;  %v809_v0 = vpop.permute.xlu0 %808 }
  0xc5   : > { %864 = vst.msk [vmem:[#allocation2 + $0x48] sm:$0xff] %vm854_vm8, %v825_v63  ;;  %856 = vst.msk [vmem:[#allocation2 + $0x8] sm:$0xff] %vm854_vm8, %v809_v0 }
  0xc6   : > { %1154 = vrot.lane.b32.xlu1 %v1121_v59, %s1985_s13  ;;  %1138 = vrot.lane.b32.xlu0 %v1101_v60, %s1985_s13  ;;  %v680_v59 = vsel %vm333_vm1, %v2109_v8, %v679_v55 }
  0xc8   : > { %v931_v3 = vpop.permute.xlu1 %930  ;;  %v915_v4 = vpop.permute.xlu0 %914 }
  0xc9   : > { %971 = vst.msk [vmem:[#allocation2 + $0x40] sm:$0xff] %vm962_vm9, %v931_v3  ;;  %963 = vst.msk [vmem:[#allocation2] sm:$0xff] %vm962_vm9, %v915_v4  ;;  %v804_v3 = vrot.slane %v1678_v48, 2  ;;  %v784_v4 = vrot.slane %v1666_v53, 2 }
  0xca   : > { %404 = vrot.lane.b32.xlu1 %v373_v1, %s1978_s23  ;;  %388 = vrot.lane.b32.xlu0 %v353_v2, %s1978_s23 }
  0xcc   : > { %v503_v9 = vpop.permute.xlu1 %502  ;;  %v487_v11 = vpop.permute.xlu0 %486 }
  0xcd   : > { %540 = vst.msk [vmem:[#allocation2 + $0x58] sm:$0xff] %vm528_vm5, %v503_v9  ;;  %532 = vst.msk [vmem:[#allocation2 + $0x18] sm:$0xff] %vm528_vm5, %v487_v11 }
  0xce   : > { %508 = vrot.lane.b32.xlu1 %v1119_v34, %s1979_s24  ;;  %492 = vrot.lane.b32.xlu0 %v1099_v35, %s1979_s24  ;;  %v1701_v34 = vld [vmem:[%s2090_s14 + $0xd0] sm:$0x3] }
  0xcf   : > { %v1689_v35 = vld [vmem:[%s2090_s14 + $0x70] sm:$0x3]  ;;  %v1020_v41 = vrot.slane %v1701_v34, 1  ;;  %v1125_v62 = vrot.slane %v1701_v34, 2 }
  0xd0   : > { %v609_v14 = vpop.permute.xlu1 %608  ;;  %v593_v15 = vpop.permute.xlu0 %592  ;;  %v1000_v42 = vrot.slane %v1689_v35, 1  ;;  %v1105_v63 = vrot.slane %v1689_v35, 2 }
  0xd1   : > { %647 = vst.msk [vmem:[#allocation2 + $0x50] sm:$0xff] %vm636_vm6, %v609_v14  ;;  %639 = vst.msk [vmem:[#allocation2 + $0x10] sm:$0xff] %vm636_vm6, %v593_v15  ;;  %v1702_v15 = vld [vmem:[%s2090_s14 + $0xd8] sm:$0xff] }
  0xd2   : > { %832 = vrot.lane.b32.xlu1 %v800_v12, %s1982_s5  ;;  %816 = vrot.lane.b32.xlu0 %v780_v13, %s1982_s5  ;;  %v1001_v47 = vsel %vm333_vm1, %v2109_v8, %v1000_v42  ;;  %v1126_v8 = vsel %vm439_vm2, %v1123_v46, %v1125_v62  ;;  %v1106_v2 = vsel %vm439_vm2, %v2138_v18, %v1105_v63 }
  0xd3   : > { %v785_v12 = vsel %vm439_vm2, %v2138_v18, %v784_v4  ;;  %v1022_v18 = vrot.slane %v1702_v15, 1 }
  0xd4   : > { %v933_v21 = vpop.permute.xlu1 %932  ;;  %v917_v23 = vpop.permute.xlu0 %916 }
  0xd5   : > { %972 = vst.msk [vmem:[#allocation2 + $0x48] sm:$0xff] %vm962_vm9, %v933_v21  ;;  %964 = vst.msk [vmem:[#allocation2 + $0x8] sm:$0xff] %vm962_vm9, %v917_v23  ;;  %v1703_v21 = vld [vmem:[%s2090_s14 + $0xe0] sm:$0xff] }
  0xd6   : > { %938 = vrot.lane.b32.xlu1 %v2497_v16, %s1983_s6  ;;  %922 = vrot.lane.b32.xlu0 %v2112_v10, %s1983_s6  ;;  %v1691_v23 = vld [vmem:[%s2090_s14 + $0x80] sm:$0xff] }
  0xd7   : > { %v1108_v34 = vrot.slane %v1691_v23, 2 }
  0xd8   : > { %v1044_v31 = vpop.permute.xlu1 %1043  ;;  %v1028_v32 = vpop.permute.xlu0 %1027 }
  0xd9   : > { %1084 = vst.msk [vmem:[#allocation2 + $0x40] sm:$0xff] %vm1075_vm10, %v1044_v31  ;;  %1076 = vst.msk [vmem:[#allocation2] sm:$0xff] %vm1075_vm10, %v1028_v32  ;;  %v1003_v31 = vrot.slane %v1691_v23, 1 }
  0xda   : > { %510 = vrot.lane.b32.xlu1 %v479_v24, %s1979_s24  ;;  %494 = vrot.lane.b32.xlu0 %v459_v30, %s1979_s24  ;;  %v1023_v30 = vrot.slane %v1703_v21, 1 }
  0xdc   : > { %v611_v20 = vpop.permute.xlu1 %610  ;;  %v595_v25 = vpop.permute.xlu0 %594  ;;  %v1024_v36 = vsel %vm333_vm1, %v1022_v18, %v1023_v30 }
  0xdd   : > { %648 = vst.msk [vmem:[#allocation2 + $0x58] sm:$0xff] %vm636_vm6, %v611_v20  ;;  %640 = vst.msk [vmem:[#allocation2 + $0x18] sm:$0xff] %vm636_vm6, %v595_v25  ;;  %v1704_v25 = vld [vmem:[%s2090_s14 + $0xe8] sm:$0x3] }
  0xde   : > { %616 = vrot.lane.b32.xlu1 %v2497_v16, %s2837_s11  ;;  %600 = vrot.lane.b32.xlu0 %v2112_v10, %s2837_s11  ;;  %v1690_v16 = vld [vmem:[%s2090_s14 + $0x78] sm:$0xff] }
  0xdf   : > { %v1002_v24 = vrot.slane %v1690_v16, 1 }
  0xe0   : > { %v722_v37 = vpop.permute.xlu1 %721  ;;  %v706_v38 = vpop.permute.xlu0 %705 }
  0xe1   : > { %760 = vst.msk [vmem:[#allocation2 + $0x50] sm:$0xff] %vm749_vm7, %v722_v37  ;;  %752 = vst.msk [vmem:[#allocation2 + $0x10] sm:$0xff] %vm749_vm7, %v706_v38  ;;  %v1025_v37 = vrot.slane %v1704_v25, 1 }
  0xe2   : > { %940 = vrot.lane.b32.xlu1 %v1700_v26, %s1983_s6  ;;  %924 = vrot.lane.b32.xlu0 %v2102_v6, %s1983_s6 }
  0xe3   : > { %v1026_v35 = vsel %vm333_vm1, %v1023_v30, %v1025_v37 }
  0xe4   : > { %v1046_v28 = vpop.permute.xlu1 %1045  ;;  %v1030_v10 = vpop.permute.xlu0 %1029 }
  0xe5   : > { %1085 = vst.msk [vmem:[#allocation2 + $0x48] sm:$0xff] %vm1075_vm10, %v1046_v28  ;;  %1077 = vst.msk [vmem:[#allocation2 + $0x8] sm:$0xff] %vm1075_vm10, %v1030_v10  ;;  %v1127_v10 = vrot.slane %v1702_v15, 2 }
  0xe6   : > { %1051 = vrot.lane.b32.xlu1 %v1019_v39, %s2838_s12  ;;  %1035 = vrot.lane.b32.xlu0 %v2153_v22, %s2838_s12 }
  0xe8   : > { %v1149_v40 = vpop.permute.xlu1 %1148  ;;  %v1133_v33 = vpop.permute.xlu0 %1132 }
  0xe9   : > { %1189 = vst.msk [vmem:[#allocation2 + $0x40] sm:$0xff] %vm1180_vm11, %v1149_v40  ;;  %1181 = vst.msk [vmem:[#allocation2] sm:$0xff] %vm1180_vm11, %v1133_v33  ;;  %v1107_v40 = vrot.slane %v1690_v16, 2  ;;  %v1128_v33 = vrot.slane %v1703_v21, 2 }
  0xea   : > { %618 = vrot.lane.b32.xlu1 %v1700_v26, %s2837_s11  ;;  %602 = vrot.lane.b32.xlu0 %v2102_v6, %s2837_s11  ;;  %v1021_v6 = vsel %vm333_vm1, %v1018_v27, %v1020_v41  ;;  %v1692_v26 = vld [vmem:[%s2090_s14 + $0x88] sm:$0x3]  ;;  %v1004_v27 = vsel %vm333_vm1, %v1002_v24, %v1003_v31  ;;  %s246_s14 = sand.u32 1, %s1952_s16   ;;  %s1728_s11 = sshll.u32 %s1509_s8, 7 }
  0xeb   : > { %v1005_v38 = vrot.slane %v1692_v26, 1  ;;  %s2763_s23 = scalar_lea.hbm %s2830_s4, %s1728_s11 }
  0xec   : > { %v399_v43 = vpop.permute.xlu1 %398  ;;  %v383_v44 = vpop.permute.xlu0 %382 }
  0xed   : > { %435 = vst.msk [vmem:[#allocation2 + $0x60] sm:$0xff] %vm422_vm4, %v399_v43  ;;  %427 = vst.msk [vmem:[#allocation2 + $0x20] sm:$0xff] %vm422_vm4, %v383_v44  ;;  %v1006_v41 = vsel %vm333_vm1, %v1003_v31, %v1005_v38  ;;  %v1129_v44 = vsel %vm439_vm2, %v1127_v10, %v1128_v33 }
  0xee   : > { %729 = vrot.lane.b32.xlu1 %v1019_v39, %s1981_s30  ;;  %713 = vrot.lane.b32.xlu0 %v2153_v22, %s1981_s30  ;;  %v1124_v22 = vsel %vm439_vm2, %v1122_v45, %v1123_v46  ;;  %v1109_v45 = vsel %vm439_vm2, %v1107_v40, %v1108_v34 }
  0xf0   : > { %v724_v49 = vpop.permute.xlu1 %723  ;;  %v708_v50 = vpop.permute.xlu0 %707  ;;  %v1197_v51 = vld [vmem:[#allocation2] sm:$0xff] }
  0xf1   : > { %v1205_v52 = vld [vmem:[#allocation2 + $0x40] sm:$0xff]  ;;  %761 = vst.msk [vmem:[#allocation2 + $0x58] sm:$0xff] %vm749_vm7, %v724_v49  ;;  %753 = vst.msk [vmem:[#allocation2 + $0x18] sm:$0xff] %vm749_vm7, %v708_v50  ;;  %1763 = vmatprep.mubr.msk.f32.mxu0 %vm1225_vm12, %v1197_v51 }
  0xf2   : > { %1775 = vmatprep.mubr.msk.f32.mxu1 %vm1225_vm12, %v1205_v52  ;;  %1053 = vrot.lane.b32.xlu1 %v1021_v6, %s2838_s12  ;;  %v1110_v6 = vrot.slane %v1692_v26, 2 }
  0xf3   : > { %1037 = vrot.lane.b32.xlu0 %v1001_v47, %s2838_s12 }
  0xf4   : > { %v827_v56 = vpop.permute.xlu1 %826  ;;  %v811_v57 = vpop.permute.xlu0 %810  ;;  %v1111_v50 = vsel %vm439_vm2, %v1108_v34, %v1110_v6 }
  0xf5   : > { %865 = vst.msk [vmem:[#allocation2 + $0x50] sm:$0xff] %vm854_vm8, %v827_v56  ;;  %857 = vst.msk [vmem:[#allocation2 + $0x10] sm:$0xff] %vm854_vm8, %v811_v57 }
  0xf6   : > { %1156 = vrot.lane.b32.xlu1 %v1124_v22, %s1985_s13 }
  0xf7   : > { %1140 = vrot.lane.b32.xlu0 %v2184_v29, %s1985_s13 }
  0xf8   : > { %v1151_v60 = vpop.permute.xlu1 %1150  ;;  %v1135_v61 = vpop.permute.xlu0 %1134 }
  0xf9   : > { %1190 = vst.msk [vmem:[#allocation2 + $0x48] sm:$0xff] %vm1180_vm11, %v1151_v60  ;;  %1182 = vst.msk [vmem:[#allocation2 + $0x8] sm:$0xff] %vm1180_vm11, %v1135_v61 }
  0xfa   : > { %731 = vrot.lane.b32.xlu1 %v700_v58, %s1981_s30 }
  0xfb   : > { %715 = vrot.lane.b32.xlu0 %v680_v59, %s1981_s30  ;;  %s2773_s30 = scalar_lea.sflag [#allocation4], %s246_s14 }
  0xfc   : > { %v401_v0 = vpop.permute.xlu1 %400  ;;  %v385_v1 = vpop.permute.xlu0 %384 }
  0xfd   : > { %436 = vst.msk [vmem:[#allocation2 + $0x68] sm:$0xff] %vm422_vm4, %v401_v0  ;;  %428 = vst.msk [vmem:[#allocation2 + $0x28] sm:$0xff] %vm422_vm4, %v385_v1 }
  0xfe   : > { %834 = vrot.lane.b32.xlu1 %v1124_v22, %s1982_s5 }
  0xff   : > { %818 = vrot.lane.b32.xlu0 %v2184_v29, %s1982_s5  ;;  %v805_v29 = vsel %vm439_vm2, %v1123_v46, %v804_v3  ;;  %v1130_v46 = vrot.slane %v1704_v25, 2 }
 0x100   : > { %v505_v5 = vpop.permute.xlu1 %504  ;;  %v489_v7 = vpop.permute.xlu0 %488  ;;  %v1198_v9 = vld [vmem:[#allocation2 + $0x8] sm:$0xff] }
 0x101   : > { %v1206_v11 = vld [vmem:[#allocation2 + $0x48] sm:$0xff]  ;;  %541 = vst.msk [vmem:[#allocation2 + $0x60] sm:$0xff] %vm528_vm5, %v505_v5  ;;  %533 = vst.msk [vmem:[#allocation2 + $0x20] sm:$0xff] %vm528_vm5, %v489_v7  ;;  %1764 = vmatmul.mubr.msk.f32.vlgmr.msra.gmra.mrb[0].mxu0 %vm1225_vm12, %v1198_v9  ;;  %v1131_v49 = vsel %vm439_vm2, %v1128_v33, %v1130_v46 }
 0x102   : > { %1776 = vmatmul.mubr.msk.f32.vlgmr.msra.gmra.mrb[0].mxu1 %vm1225_vm12, %v1206_v11  ;;  %1158 = vrot.lane.b32.xlu1 %v1126_v8, %s1985_s13 }
 0x103   : > { %1142 = vrot.lane.b32.xlu0 %v1106_v2, %s1985_s13 }
 0x104   : > { %v829_v13 = vpop.permute.xlu1 %828  ;;  %v813_v14 = vpop.permute.xlu0 %812 }
 0x105   : > { %866 = vst.msk [vmem:[#allocation2 + $0x58] sm:$0xff] %vm854_vm8, %v829_v13  ;;  %858 = vst.msk [vmem:[#allocation2 + $0x18] sm:$0xff] %vm854_vm8, %v813_v14 }
 0x106   : > { %836 = vrot.lane.b32.xlu1 %v805_v29, %s1982_s5 }
 0x107   : > { %820 = vrot.lane.b32.xlu0 %v785_v12, %s1982_s5  ;;  %s1649_s5 = sshll.u32 %s246_s14, 7 }
 0x108   : > { %v935_v17 = vpop.permute.xlu1 %934  ;;  %v919_v19 = vpop.permute.xlu0 %918  ;;  %s2719_s9 = scalar_lea.vmem [#allocation3], %s1649_s5 }
 0x109   : > { %973 = vst.msk [vmem:[#allocation2 + $0x50] sm:$0xff] %vm962_vm9, %v935_v17  ;;  %965 = vst.msk [vmem:[#allocation2 + $0x10] sm:$0xff] %vm962_vm9, %v919_v19 }
 0x10a   : > { %942 = vrot.lane.b32.xlu1 %v1702_v15, %s1983_s6 }
 0x10b   : > { %926 = vrot.lane.b32.xlu0 %v1690_v16, %s1983_s6 }
 0x10c   : > { %v507_v32 = vpop.permute.xlu1 %506  ;;  %v491_v20 = vpop.permute.xlu0 %490 }
 0x10d   : > { %542 = vst.msk [vmem:[#allocation2 + $0x68] sm:$0xff] %vm528_vm5, %v507_v32  ;;  %534 = vst.msk [vmem:[#allocation2 + $0x28] sm:$0xff] %vm528_vm5, %v491_v20 }
 0x10e   : > { %944 = vrot.lane.b32.xlu1 %v1703_v21, %s1983_s6 }
 0x10f   : > { %928 = vrot.lane.b32.xlu0 %v1691_v23, %s1983_s6  ;;  %s1986_s6 = smov [#allocation3]  }
 0x110   : > { %v613_v39 = vpop.permute.xlu1 %612  ;;  %v597_v28 = vpop.permute.xlu0 %596 }
 0x111   : > { %649 = vst.msk [vmem:[#allocation2 + $0x60] sm:$0xff] %vm636_vm6, %v613_v39  ;;  %641 = vst.msk [vmem:[#allocation2 + $0x20] sm:$0xff] %vm636_vm6, %v597_v28 }
 0x112   : > { %1055 = vrot.lane.b32.xlu1 %v1024_v36, %s2838_s12 }
 0x113   : > { %1039 = vrot.lane.b32.xlu0 %v1004_v27, %s2838_s12 }
 0x114   : > { %v937_v42 = vpop.permute.xlu1 %936  ;;  %v921_v43 = vpop.permute.xlu0 %920 }
 0x115   : > { %974 = vst.msk [vmem:[#allocation2 + $0x58] sm:$0xff] %vm962_vm9, %v937_v42  ;;  %966 = vst.msk [vmem:[#allocation2 + $0x18] sm:$0xff] %vm962_vm9, %v921_v43 }
 0x116   : > { %1057 = vrot.lane.b32.xlu1 %v1026_v35, %s2838_s12 }
 0x117   : > { %1041 = vrot.lane.b32.xlu0 %v1006_v41, %s2838_s12  ;;  %s1512_s12 = sshll.u32 %s2719_s9, 4  ;;  %s2765_s12 = int_to_ptr.vmem [resolvable:$true] %s1512_s12 }
 0x118   : > { %v1048_v47 = vpop.permute.xlu1 %1047  ;;  %v1032_v48 = vpop.permute.xlu0 %1031  ;;  %s1882_s5 = scalar_lea.vmem %s2765_s12, 2048 }
 0x119   : > { %1086 = vst.msk [vmem:[#allocation2 + $0x50] sm:$0xff] %vm1075_vm10, %v1048_v47  ;;  %1078 = vst.msk [vmem:[#allocation2 + $0x10] sm:$0xff] %vm1075_vm10, %v1032_v48  ;;  %p1883_p13 = scmp.ne.s32.totalorder %s2765_s12, %s1882_s5 }
 0x11a   : > { %1160 = vrot.lane.b32.xlu1 %v1129_v44, %s1985_s13 }
 0x11b   : > { %1144 = vrot.lane.b32.xlu0 %v1109_v45, %s1985_s13  ;;  %p1884_p0 = pnand %p1883_p13, %p2064_p3 }
 0x11c   : > { %v615_v51 = vpop.permute.xlu1 %614  ;;  %v599_v52 = vpop.permute.xlu0 %598 }
 0x11d   : > { %650 = vst.msk [vmem:[#allocation2 + $0x68] sm:$0xff] %vm636_vm6, %v615_v51  ;;  %642 = vst.msk [vmem:[#allocation2 + $0x28] sm:$0xff] %vm636_vm6, %v599_v52  ;;  %p1885_p1 = pneg %p1884_p0 }
 0x11e   : > { %1162 = vrot.lane.b32.xlu1 %v1131_v49, %s1985_s13 }
 0x11f   : > { %1146 = vrot.lane.b32.xlu0 %v1111_v50, %s1985_s13  ;;  %s1886_s13 = sshll.u32 %s1986_s6, 4  ;;  %s1887_s13 = int_to_ptr.vmem [resolvable:$false] %s1886_s13 }
 0x120   : > { %v726_v53 = vpop.permute.xlu1 %725  ;;  %v710_v22 = vpop.permute.xlu0 %709  ;;  %s1888_s10 = scalar_lea.vmem %s1887_s13, 4096  ;;  %p1889_p2 = scmp.lt.s32.totalorder %s2765_s12, %s1887_s13 }
 0x121   : > { %762 = vst.msk [vmem:[#allocation2 + $0x60] sm:$0xff] %vm749_vm7, %v726_v53  ;;  %754 = vst.msk [vmem:[#allocation2 + $0x20] sm:$0xff] %vm749_vm7, %v710_v22  ;;  %p1890_p4 = scmp.lt.s32.totalorder %s1888_s10, %s1882_s5 }
 0x123   : > { %p1891_p5 = por %p1890_p4, %p1889_p2 }
 0x124   : > { %v1050_v54 = vpop.permute.xlu1 %1049  ;;  %v1034_v55 = vpop.permute.xlu0 %1033 }
 0x125   : > { %1087 = vst.msk [vmem:[#allocation2 + $0x58] sm:$0xff] %vm1075_vm10, %v1050_v54  ;;  %1079 = vst.msk [vmem:[#allocation2 + $0x18] sm:$0xff] %vm1075_vm10, %v1034_v55  ;;  %p1892_p6 = pnand %p1891_p5, %p1885_p1 }
 0x128   : > { %v1153_v56 = vpop.permute.xlu1 %1152  ;;  %v1137_v57 = vpop.permute.xlu0 %1136 }
 0x129   : > { %1191 = vst.msk [vmem:[#allocation2 + $0x50] sm:$0xff] %vm1180_vm11, %v1153_v56  ;;  %1183 = vst.msk [vmem:[#allocation2 + $0x10] sm:$0xff] %vm1180_vm11, %v1137_v57 }
 0x12c   : > { %v403_v58 = vpop.permute.xlu1 %402  ;;  %v387_v59 = vpop.permute.xlu0 %386 }
 0x12d   : > { %437 = vst.msk [vmem:[#allocation2 + $0x70] sm:$0xff] %vm422_vm4, %v403_v58  ;;  %429 = vst.msk [vmem:[#allocation2 + $0x30] sm:$0xff] %vm422_vm4, %v387_v59  ;;  %v2702_v58 = vld [vmem:[%s2828_s2] ss:$0 sm:$0xff] }
 0x130   : > { %v728_v60 = vpop.permute.xlu1 %727  ;;  %v712_v61 = vpop.permute.xlu0 %711  ;;  %v1199_v62 = vld [vmem:[#allocation2 + $0x10] sm:$0xff] }
 0x131   : > { %v1207_v63 = vld [vmem:[#allocation2 + $0x50] sm:$0xff]  ;;  %763 = vst.msk [vmem:[#allocation2 + $0x68] sm:$0xff] %vm749_vm7, %v728_v60  ;;  %755 = vst.msk [vmem:[#allocation2 + $0x28] sm:$0xff] %vm749_vm7, %v712_v61  ;;  %1766 = vmatprep.mubr.msk.f32.mxu0 %vm1225_vm12, %v1199_v62  ;;  %v2709_v60 = vld [vmem:[%s2829_s3] ss:$0 sm:$0xff] }
 0x132   : > { %1778 = vmatprep.mubr.msk.f32.mxu1 %vm1225_vm12, %v1207_v63 }
 0x134   : > { %v831_v0 = vpop.permute.xlu1 %830  ;;  %v815_v1 = vpop.permute.xlu0 %814 }
 0x135   : > { %867 = vst.msk [vmem:[#allocation2 + $0x60] sm:$0xff] %vm854_vm8, %v831_v0  ;;  %859 = vst.msk [vmem:[#allocation2 + $0x20] sm:$0xff] %vm854_vm8, %v815_v1 }
 0x138   : > { %v1155_v8 = vpop.permute.xlu1 %1154  ;;  %v1139_v2 = vpop.permute.xlu0 %1138 }
 0x139   : > { %1192 = vst.msk [vmem:[#allocation2 + $0x58] sm:$0xff] %vm1180_vm11, %v1155_v8  ;;  %1184 = vst.msk [vmem:[#allocation2 + $0x18] sm:$0xff] %vm1180_vm11, %v1139_v2 }
 0x13c   : > { %v405_v3 = vpop.permute.xlu1 %404  ;;  %v389_v4 = vpop.permute.xlu0 %388 }
 0x13d   : > { %438 = vst.msk [vmem:[#allocation2 + $0x78] sm:$0xff] %vm422_vm4, %v405_v3  ;;  %430 = vst.msk [vmem:[#allocation2 + $0x38] sm:$0xff] %vm422_vm4, %v389_v4 }
 0x140   : > { %v509_v5 = vpop.permute.xlu1 %508  ;;  %v493_v7 = vpop.permute.xlu0 %492  ;;  %v1200_v9 = vld [vmem:[#allocation2 + $0x18] sm:$0xff] }
 0x141   : > { %v1208_v11 = vld [vmem:[#allocation2 + $0x58] sm:$0xff]  ;;  %543 = vst.msk [vmem:[#allocation2 + $0x70] sm:$0xff] %vm528_vm5, %v509_v5  ;;  %535 = vst.msk [vmem:[#allocation2 + $0x30] sm:$0xff] %vm528_vm5, %v493_v7  ;;  %1767 = vmatmul.mubr.msk.f32.gmra.mrb[2].mxu0 %vm1225_vm12, %v1200_v9 }
 0x142   : > { %1779 = vmatmul.mubr.msk.f32.gmra.mrb[2].mxu1 %vm1225_vm12, %v1208_v11 }
 0x144   : > { %v833_v29 = vpop.permute.xlu1 %832  ;;  %v817_v12 = vpop.permute.xlu0 %816 }
 0x145   : > { %868 = vst.msk [vmem:[#allocation2 + $0x68] sm:$0xff] %vm854_vm8, %v833_v29  ;;  %860 = vst.msk [vmem:[#allocation2 + $0x28] sm:$0xff] %vm854_vm8, %v817_v12 }
 0x148   : > { %v939_v13 = vpop.permute.xlu1 %938  ;;  %v923_v14 = vpop.permute.xlu0 %922 }
 0x149   : > { %975 = vst.msk [vmem:[#allocation2 + $0x60] sm:$0xff] %vm962_vm9, %v939_v13  ;;  %967 = vst.msk [vmem:[#allocation2 + $0x20] sm:$0xff] %vm962_vm9, %v923_v14 }
 0x14c   : > { %v511_v15 = vpop.permute.xlu1 %510  ;;  %v495_v16 = vpop.permute.xlu0 %494 }
 0x14d   : > { %544 = vst.msk [vmem:[#allocation2 + $0x78] sm:$0xff] %vm528_vm5, %v511_v15  ;;  %536 = vst.msk [vmem:[#allocation2 + $0x38] sm:$0xff] %vm528_vm5, %v495_v16 }
 0x150   : > { %v617_v17 = vpop.permute.xlu1 %616  ;;  %v601_v19 = vpop.permute.xlu0 %600 }
 0x151   : > { %651 = vst.msk [vmem:[#allocation2 + $0x70] sm:$0xff] %vm636_vm6, %v617_v17  ;;  %643 = vst.msk [vmem:[#allocation2 + $0x30] sm:$0xff] %vm636_vm6, %v601_v19 }
 0x154   : > { %v941_v21 = vpop.permute.xlu1 %940  ;;  %v925_v23 = vpop.permute.xlu0 %924 }
 0x155   : > { %976 = vst.msk [vmem:[#allocation2 + $0x68] sm:$0xff] %vm962_vm9, %v941_v21  ;;  %968 = vst.msk [vmem:[#allocation2 + $0x28] sm:$0xff] %vm962_vm9, %v925_v23 }
 0x158   : > { %v1052_v18 = vpop.permute.xlu1 %1051  ;;  %v1036_v24 = vpop.permute.xlu0 %1035 }
 0x159   : > { %1088 = vst.msk [vmem:[#allocation2 + $0x60] sm:$0xff] %vm1075_vm10, %v1052_v18  ;;  %1080 = vst.msk [vmem:[#allocation2 + $0x20] sm:$0xff] %vm1075_vm10, %v1036_v24 }
 0x15c   : > { %v619_v30 = vpop.permute.xlu1 %618  ;;  %v603_v31 = vpop.permute.xlu0 %602 }
 0x15d   : > { %652 = vst.msk [vmem:[#allocation2 + $0x78] sm:$0xff] %vm636_vm6, %v619_v30  ;;  %644 = vst.msk [vmem:[#allocation2 + $0x38] sm:$0xff] %vm636_vm6, %v603_v31 }
 0x160   : > { %v730_v32 = vpop.permute.xlu1 %729  ;;  %v714_v20 = vpop.permute.xlu0 %713 }
 0x161   : > { %764 = vst.msk [vmem:[#allocation2 + $0x70] sm:$0xff] %vm749_vm7, %v730_v32  ;;  %756 = vst.msk [vmem:[#allocation2 + $0x30] sm:$0xff] %vm749_vm7, %v714_v20 }
 0x164   : > { %v1054_v25 = vpop.permute.xlu1 %1053 }
 0x165   : > { %v1038_v26 = vpop.permute.xlu0 %1037  ;;  %1089 = vst.msk [vmem:[#allocation2 + $0x68] sm:$0xff] %vm1075_vm10, %v1054_v25 }
 0x166   : > { %1081 = vst.msk [vmem:[#allocation2 + $0x28] sm:$0xff] %vm1075_vm10, %v1038_v26 }
 0x168   : > { %v1157_v36 = vpop.permute.xlu1 %1156 }
 0x169   : > { %v1141_v27 = vpop.permute.xlu0 %1140  ;;  %1193 = vst.msk [vmem:[#allocation2 + $0x60] sm:$0xff] %vm1180_vm11, %v1157_v36 }
 0x16a   : > { %1185 = vst.msk [vmem:[#allocation2 + $0x20] sm:$0xff] %vm1180_vm11, %v1141_v27 }
 0x16c   : > { %v732_v37 = vpop.permute.xlu1 %731 }
 0x16d   : > { %v716_v38 = vpop.permute.xlu0 %715  ;;  %765 = vst.msk [vmem:[#allocation2 + $0x78] sm:$0xff] %vm749_vm7, %v732_v37 }
 0x16e   : > { %757 = vst.msk [vmem:[#allocation2 + $0x38] sm:$0xff] %vm749_vm7, %v716_v38 }
 0x170   : > { %v835_v39 = vpop.permute.xlu1 %834  ;;  %v1209_v40 = vld [vmem:[#allocation2 + $0x60] sm:$0xff] }
 0x171   : > { %v819_v28 = vpop.permute.xlu0 %818  ;;  %v1201_v10 = vld [vmem:[#allocation2 + $0x20] sm:$0xff]  ;;  %869 = vst.msk [vmem:[#allocation2 + $0x70] sm:$0xff] %vm854_vm8, %v835_v39  ;;  %1781 = vmatprep.mubr.msk.f32.mxu1 %vm1225_vm12, %v1209_v40 }
 0x172   : > { %861 = vst.msk [vmem:[#allocation2 + $0x30] sm:$0xff] %vm854_vm8, %v819_v28  ;;  %1769 = vmatprep.mubr.msk.f32.mxu0 %vm1225_vm12, %v1201_v10 }
 0x174   : > { %v1159_v33 = vpop.permute.xlu1 %1158 }
 0x175   : > { %v1143_v34 = vpop.permute.xlu0 %1142  ;;  %1194 = vst.msk [vmem:[#allocation2 + $0x68] sm:$0xff] %vm1180_vm11, %v1159_v33 }
 0x176   : > { %1186 = vst.msk [vmem:[#allocation2 + $0x28] sm:$0xff] %vm1180_vm11, %v1143_v34 }
 0x178   : > { %v837_v35 = vpop.permute.xlu1 %836 }
 0x179   : > { %v821_v41 = vpop.permute.xlu0 %820  ;;  %870 = vst.msk [vmem:[#allocation2 + $0x78] sm:$0xff] %vm854_vm8, %v837_v35 }
 0x17a   : > { %862 = vst.msk [vmem:[#allocation2 + $0x38] sm:$0xff] %vm854_vm8, %v821_v41 }
 0x17c   : > { %v943_v42 = vpop.permute.xlu1 %942  ;;  %v1210_v45 = vld [vmem:[#allocation2 + $0x68] sm:$0xff] }
 0x17d   : > { %v927_v43 = vpop.permute.xlu0 %926  ;;  %v1202_v44 = vld [vmem:[#allocation2 + $0x28] sm:$0xff]  ;;  %977 = vst.msk [vmem:[#allocation2 + $0x70] sm:$0xff] %vm962_vm9, %v943_v42  ;;  %1782 = vmatmul.mubr.msk.f32.gmra.mrb[4].mxu1 %vm1225_vm12, %v1210_v45 }
 0x17e   : > { %969 = vst.msk [vmem:[#allocation2 + $0x30] sm:$0xff] %vm962_vm9, %v927_v43  ;;  %1770 = vmatmul.mubr.msk.f32.gmra.mrb[4].mxu0 %vm1225_vm12, %v1202_v44 }
 0x180   : > { %v945_v46 = vpop.permute.xlu1 %944 }
 0x181   : > { %v929_v6 = vpop.permute.xlu0 %928  ;;  %978 = vst.msk [vmem:[#allocation2 + $0x78] sm:$0xff] %vm962_vm9, %v945_v46 }
 0x182   : > { %970 = vst.msk [vmem:[#allocation2 + $0x38] sm:$0xff] %vm962_vm9, %v929_v6 }
 0x184   : > { %v1056_v47 = vpop.permute.xlu1 %1055 }
 0x185   : > { %v1040_v48 = vpop.permute.xlu0 %1039  ;;  %1090 = vst.msk [vmem:[#allocation2 + $0x70] sm:$0xff] %vm1075_vm10, %v1056_v47 }
 0x186   : > { %1082 = vst.msk [vmem:[#allocation2 + $0x30] sm:$0xff] %vm1075_vm10, %v1040_v48 }
 0x188   : > { %v1058_v49 = vpop.permute.xlu1 %1057 }
 0x189   : > { %v1042_v50 = vpop.permute.xlu0 %1041  ;;  %1091 = vst.msk [vmem:[#allocation2 + $0x78] sm:$0xff] %vm1075_vm10, %v1058_v49 }
 0x18a   : > { %1083 = vst.msk [vmem:[#allocation2 + $0x38] sm:$0xff] %vm1075_vm10, %v1042_v50 }
 0x18c   : > { %v1161_v51 = vpop.permute.xlu1 %1160 }
 0x18d   : > { %v1145_v52 = vpop.permute.xlu0 %1144  ;;  %1195 = vst.msk [vmem:[#allocation2 + $0x70] sm:$0xff] %vm1180_vm11, %v1161_v51 }
 0x18e   : > { %1187 = vst.msk [vmem:[#allocation2 + $0x30] sm:$0xff] %vm1180_vm11, %v1145_v52 }
 0x190   : > { %v1163_v53 = vpop.permute.xlu1 %1162 }
 0x191   : > { %v1147_v22 = vpop.permute.xlu0 %1146  ;;  %1196 = vst.msk [vmem:[#allocation2 + $0x78] sm:$0xff] %vm1180_vm11, %v1163_v53 }
 0x192   : > { %1188 = vst.msk [vmem:[#allocation2 + $0x38] sm:$0xff] %vm1180_vm11, %v1147_v22 }
 0x194   : > { %v1211_v55 = vld [vmem:[#allocation2 + $0x70] sm:$0xff] }
 0x195   : > { %v1203_v54 = vld [vmem:[#allocation2 + $0x30] sm:$0xff]  ;;  %1784 = vmatprep.mubr.msk.f32.mxu1 %vm1225_vm12, %v1211_v55 }
 0x196   : > { %1772 = vmatprep.mubr.msk.f32.mxu0 %vm1225_vm12, %v1203_v54 }
 0x198   : > { %v1212_v57 = vld [vmem:[#allocation2 + $0x78] sm:$0xff] }
 0x199   : > { %v1204_v56 = vld [vmem:[#allocation2 + $0x38] sm:$0xff]  ;;  %1785 = vmatmul.mubr.msk.f32.gmra.mrb[6].mxu1 %vm1225_vm12, %v1212_v57 }
 0x19a   : > { %1773 = vmatmul.mubr.msk.f32.gmra.mrb[6].mxu0 %vm1225_vm12, %v1204_v56 }
 0x1d4   : > { %v1765_v59 = vpop.f32.mrb[0].mxu0 }
 0x1d5   : > { %v1777_v61 = vpop.f32.mrb[0].mxu1  ;;  %v1350_v62 = vadd.f32 %v1765_v59, %v2702_v58  ;;  %v1344_v0 = vpop.f32.mrb[1].mxu0 }
 0x1d6   : > { %v1390_v63 = vadd.f32 %v1777_v61, %v2702_v58  ;;  %v1384_v1 = vpop.f32.mrb[1].mxu1  ;;  %v1345_v8 = vadd.f32 %v2702_v58, %v1344_v0 }
 0x1d7   : > { %v1385_v2 = vadd.f32 %v2702_v58, %v1384_v1  ;;  %vm1424_vm13 = vcmp.gt.f32.partialorder %v1350_v62, 0.0  ;;  %v1447_v3 = vmul.f32 %v2709_v60, %v1350_v62 }
 0x1d8   : > { %vm1432_vm14 = vcmp.gt.f32.partialorder %v1390_v63, 0.0  ;;  %v1455_v4 = vmul.f32 %v2709_v60, %v1390_v63  ;;  %vm1423_vm15 = vcmp.gt.f32.partialorder %v1345_v8, 0.0  ;;  %v1446_v5 = vmul.f32 %v2709_v60, %v1345_v8 }
 0x1d9   : > { %vm1431_vm0 = vcmp.gt.f32.partialorder %v1385_v2, 0.0  ;;  %v1454_v7 = vmul.f32 %v2709_v60, %v1385_v2  ;;  %v1463_v9 = vsel %vm1424_vm13, %v1350_v62, %v1447_v3 }
 0x1da   : > { %v1471_v11 = vsel %vm1432_vm14, %v1390_v63, %v1455_v4  ;;  %1479 = vst [vmem:[%s2719_s9 + $0x8] sm:$0xff] %v1463_v9  ;;  %v1462_v29 = vsel %vm1423_vm15, %v1345_v8, %v1446_v5 }
 0x1db   : > { %1487 = vst [vmem:[%s2719_s9 + $0x48] sm:$0xff] %v1471_v11  ;;  %v1470_v12 = vsel %vm1431_vm0, %v1385_v2, %v1454_v7  ;;  %1478 = vst [vmem:[%s2719_s9] sm:$0xff] %v1462_v29 }
 0x1dc   : > { %1486 = vst [vmem:[%s2719_s9 + $0x40] sm:$0xff] %v1470_v12 }
 0x214   : > { %v1768_v13 = vpop.f32.mrb[2].mxu0 }
 0x215   : > { %v1780_v14 = vpop.f32.mrb[2].mxu1  ;;  %v1360_v15 = vadd.f32 %v1768_v13, %v2702_v58  ;;  %v1354_v17 = vpop.f32.mrb[3].mxu0 }
 0x216   : > { %v1400_v16 = vadd.f32 %v1780_v14, %v2702_v58  ;;  %v1394_v19 = vpop.f32.mrb[3].mxu1  ;;  %v1355_v21 = vadd.f32 %v2702_v58, %v1354_v17 }
 0x217   : > { %v1395_v23 = vadd.f32 %v2702_v58, %v1394_v19  ;;  %vm1426_vm1 = vcmp.gt.f32.partialorder %v1360_v15, 0.0  ;;  %v1449_v18 = vmul.f32 %v2709_v60, %v1360_v15 }
 0x218   : > { %vm1434_vm2 = vcmp.gt.f32.partialorder %v1400_v16, 0.0  ;;  %v1457_v24 = vmul.f32 %v2709_v60, %v1400_v16  ;;  %vm1425_vm3 = vcmp.gt.f32.partialorder %v1355_v21, 0.0  ;;  %v1448_v30 = vmul.f32 %v2709_v60, %v1355_v21 }
 0x219   : > { %vm1433_vm4 = vcmp.gt.f32.partialorder %v1395_v23, 0.0  ;;  %v1456_v31 = vmul.f32 %v2709_v60, %v1395_v23  ;;  %v1465_v32 = vsel %vm1426_vm1, %v1360_v15, %v1449_v18 }
 0x21a   : > { %v1473_v20 = vsel %vm1434_vm2, %v1400_v16, %v1457_v24  ;;  %1481 = vst [vmem:[%s2719_s9 + $0x18] sm:$0xff] %v1465_v32  ;;  %v1464_v25 = vsel %vm1425_vm3, %v1355_v21, %v1448_v30 }
 0x21b   : > { %1489 = vst [vmem:[%s2719_s9 + $0x58] sm:$0xff] %v1473_v20  ;;  %v1472_v26 = vsel %vm1433_vm4, %v1395_v23, %v1456_v31  ;;  %1480 = vst [vmem:[%s2719_s9 + $0x10] sm:$0xff] %v1464_v25 }
 0x21c   : > { %1488 = vst [vmem:[%s2719_s9 + $0x50] sm:$0xff] %v1472_v26 }
 0x250   : > { %v1783_v27 = vpop.f32.mrb[4].mxu1 }
 0x251   : > { %v1771_v36 = vpop.f32.mrb[4].mxu0  ;;  %v1410_v38 = vadd.f32 %v1783_v27, %v2702_v58  ;;  %v1404_v28 = vpop.f32.mrb[5].mxu1 }
 0x252   : > { %v1370_v37 = vadd.f32 %v1771_v36, %v2702_v58  ;;  %v1364_v39 = vpop.f32.mrb[5].mxu0  ;;  %v1405_v40 = vadd.f32 %v2702_v58, %v1404_v28 }
 0x253   : > { %v1365_v10 = vadd.f32 %v2702_v58, %v1364_v39  ;;  %vm1436_vm6 = vcmp.gt.f32.partialorder %v1410_v38, 0.0  ;;  %v1459_v34 = vmul.f32 %v2709_v60, %v1410_v38 }
 0x254   : > { %vm1428_vm5 = vcmp.gt.f32.partialorder %v1370_v37, 0.0  ;;  %v1451_v33 = vmul.f32 %v2709_v60, %v1370_v37  ;;  %vm1435_vm8 = vcmp.gt.f32.partialorder %v1405_v40, 0.0  ;;  %v1458_v41 = vmul.f32 %v2709_v60, %v1405_v40 }
 0x255   : > { %vm1427_vm7 = vcmp.gt.f32.partialorder %v1365_v10, 0.0  ;;  %v1450_v35 = vmul.f32 %v2709_v60, %v1365_v10  ;;  %v1475_v43 = vsel %vm1436_vm6, %v1410_v38, %v1459_v34 }
 0x256   : > { %v1467_v42 = vsel %vm1428_vm5, %v1370_v37, %v1451_v33  ;;  %1491 = vst [vmem:[%s2719_s9 + $0x68] sm:$0xff] %v1475_v43  ;;  %v1474_v45 = vsel %vm1435_vm8, %v1405_v40, %v1458_v41 }
 0x257   : > { %1483 = vst [vmem:[%s2719_s9 + $0x28] sm:$0xff] %v1467_v42  ;;  %v1466_v44 = vsel %vm1427_vm7, %v1365_v10, %v1450_v35  ;;  %1490 = vst [vmem:[%s2719_s9 + $0x60] sm:$0xff] %v1474_v45 }
 0x258   : > { %1482 = vst [vmem:[%s2719_s9 + $0x20] sm:$0xff] %v1466_v44 }
 0x26c   : > { %v1786_v6 = vpop.f32.mrb[6].mxu1 }
 0x26d   : > { %v1774_v46 = vpop.f32.mrb[6].mxu0  ;;  %v1420_v48 = vadd.f32 %v1786_v6, %v2702_v58  ;;  %v1414_v50 = vpop.f32.mrb[7].mxu1 }
 0x26e   : > { %v1380_v47 = vadd.f32 %v1774_v46, %v2702_v58  ;;  %v1374_v49 = vpop.f32.mrb[7].mxu0  ;;  %v1415_v52 = vadd.f32 %v2702_v58, %v1414_v50 }
 0x26f   : > { %v1375_v51 = vadd.f32 %v2702_v58, %v1374_v49  ;;  %vm1438_vm10 = vcmp.gt.f32.partialorder %v1420_v48, 0.0  ;;  %v1461_v22 = vmul.f32 %v2709_v60, %v1420_v48 }
 0x270   : > { %vm1430_vm9 = vcmp.gt.f32.partialorder %v1380_v47, 0.0  ;;  %v1453_v53 = vmul.f32 %v2709_v60, %v1380_v47  ;;  %vm1437_vm12 = vcmp.gt.f32.partialorder %v1415_v52, 0.0  ;;  %v1460_v55 = vmul.f32 %v2709_v60, %v1415_v52 }
 0x271   : > { %vm1429_vm11 = vcmp.gt.f32.partialorder %v1375_v51, 0.0  ;;  %v1452_v54 = vmul.f32 %v2709_v60, %v1375_v51  ;;  %v1477_v57 = vsel %vm1438_vm10, %v1420_v48, %v1461_v22 }
 0x272   : > { %v1469_v56 = vsel %vm1430_vm9, %v1380_v47, %v1453_v53  ;;  %1493 = vst [vmem:[%s2719_s9 + $0x78] sm:$0xff] %v1477_v57  ;;  %v1476_v59 = vsel %vm1437_vm12, %v1415_v52, %v1460_v55 }
 0x273   : > { %1485 = vst [vmem:[%s2719_s9 + $0x38] sm:$0xff] %v1469_v56  ;;  %v1468_v58 = vsel %vm1429_vm11, %v1375_v51, %v1452_v54  ;;  %1492 = vst [vmem:[%s2719_s9 + $0x70] sm:$0xff] %v1476_v59 }
 0x274   : > { %1484 = vst [vmem:[%s2719_s9 + $0x30] sm:$0xff] %v1468_v58 }
 0x275   : > { %1895 = shalt.err (!%p1892_p6)
}
 0x276   : > { %s1896_s14 = scalar_lea.hbm %s2763_s23, 2048  ;;  %s1900_s8 = scalar_lea.hbm %s2830_s4, 8192 }
 0x277   : > { %p1897_p7 = scmp.ne.s32.totalorder %s2763_s23, %s1896_s14  ;;  %p1901_p11 = scmp.lt.u32.totalorder %s2763_s23, %s2830_s4 }
 0x278   : > { %p1902_p12 = scmp.lt.u32.totalorder %s1900_s8, %s1896_s14  ;;  %p1904_p0 = scmp.lt.u32.totalorder %s1896_s14, %s2763_s23 }
 0x279   : > { %p1898_p9 = pnand %p1897_p7, %p2064_p3 }
 0x27a   : > { %p1903_p13 = por %p1902_p12, %p1901_p11 }
 0x27b   : > { %p1899_p10 = pneg %p1898_p9 }
 0x27c   : > { %p1905_p1 = por %p1904_p0, %p1903_p13 }
 0x27e   : > { %p1906_p2 = pnand %p1905_p1, %p1899_p10 }
 0x280   : > { %1909 = shalt.err (!%p1906_p2)
}
 0x281   : > { %s1987_s19 = smov 128  }
 0x282   : > { %1802 = dma.vmem_to_hbm [thread:$0]  (%p2064_p3), %s2765_s12, 2048, %s2763_s23, %s2773_s30, %s1987_s19, %s1987_s19, %s1979_s24  }
 0x283 PF: > { %p1808_p4 = scmp.ge.s32.totalorder %s1976_s22, 2  ;;  %s1527_s5 = sand.u32 1, %s1948_s15  }
 0x284   : > { %s1528_s6 = scalar_lea.sflag [#allocation4], %s1527_s5 }
 0x285   : > { %p1805_p5 = pnand %p1808_p4, %p2073_p8 }
 0x287   : > { %1943 = dma.done.wait (!%p1805_p5), %s1528_s6, 2048  }
 0x288   : > { %1945 = vsyncadd (!%p1805_p5), %s1528_s6, 4294965248  ;;  %s17_s22 = sadd.s32 1, %s1976_s22   ;;  %s2839_s15 = smov %s1952_s16 }
 0x289   : > { %p14_p6 = scmp.ge.s32.totalorder %s17_s22, 6   ;;  %s2840_s16 = smov %s1956_s17 }
 0x28a   : > { %s2841_s17 = smov %s2082_s7  ;;  %s2842_s18 = smov %s1968_s20 }
 0x28b   : > { %s2843_s19 = smov %s1972_s21  ;;  %s2844_s20 = smov %s2847_s25 }
 0x28c   : > { %s2845_s21 = smov %s2851_s26  ;;  %16 = sbr.rel (!%p14_p6) target bundleno = 5 (0x5), region = 83 }
 0x293   :  { %1533 = vsyncpa [#allocation4], 1 }
 0x294   :  { %1535 = vsyncpa [#allocation4 + $0x1], 1 }

</bundles_post_ra>
